<compile_context>
chip_gen: v5e
topology: v5e:2x2
jax: 0.10.0
libtpu: 0.0.40
codegen_flags: <defaults>
</compile_context>

<pallas_src>
import numpy as np
import jax
import jax.numpy as jnp
from jax.experimental import pallas as pl
from jax.experimental.pallas import tpu as pltpu

N_ANCHOR = 9
OUT_PAD = 128          # lane-pad the fused reg|cls output (36 + 18 = 54 -> 128)


def _round_up(x, m):
    return ((x + m - 1) // m) * m


def _cdiv(a, b):
    return -(-a // b)


# ----------------------------------------------------------------------------
# Anchor generation / region proposal (host-side numpy, verbatim semantics)
# ----------------------------------------------------------------------------
def generateAnchors(featureWidth, imageWidth):
    sub_sample = int(imageWidth / featureWidth)
    ratios = [0.5, 1, 2]
    anchor_scales = [4, 8, 16]
    ctr_x = np.arange(sub_sample, (featureWidth + 1) * sub_sample, sub_sample)
    ctr_y = np.arange(sub_sample, (featureWidth + 1) * sub_sample, sub_sample)
    ctr = []
    for x in range(len(ctr_x)):
        for y in range(len(ctr_y)):
            ctr += [[ctr_x[x] - int(sub_sample / 2), ctr_y[y] - int(sub_sample / 2)]]
    anchors = np.zeros((featureWidth * featureWidth * len(ratios) * len(anchor_scales), 4))
    index = 0
    for c in ctr:
        ctr_y_, ctr_x_ = c
        for i in range(len(ratios)):
            for j in range(len(anchor_scales)):
                h = sub_sample * anchor_scales[j] * np.sqrt(ratios[i])
                w = sub_sample * anchor_scales[j] * np.sqrt(1.0 / ratios[i])
                anchors[index, 0] = ctr_y_ - h / 2.0
                anchors[index, 1] = ctr_x_ - w / 2.0
                anchors[index, 2] = ctr_y_ + h / 2.0
                anchors[index, 3] = ctr_x_ + w / 2.0
                index += 1
    return anchors


def proposeRegions(pred_anchor_locs, objectness_score, imageWidth, featureWidth):
    # TODO(synk): data-dependent NMS with dynamic output size has no clean Pallas
    # equivalent; kept on host in numpy (matches the PyTorch reference behavior).
    anchors = generateAnchors(featureWidth, imageWidth)
    nms_thresh = 0.7
    n_train_pre_nms = 12000
    n_train_post_nms = 2000
    min_size = 16
    anc_height = anchors[:, 2] - anchors[:, 0]
    anc_width = anchors[:, 3] - anchors[:, 1]
    anc_ctr_y = anchors[:, 0] + 0.5 * anc_height
    anc_ctr_x = anchors[:, 1] + 0.5 * anc_width
    pred_anchor_locs_numpy = np.asarray(pred_anchor_locs[0])
    objectness_score_numpy = np.asarray(objectness_score[0])
    dy = pred_anchor_locs_numpy[:, 0::4]
    dx = pred_anchor_locs_numpy[:, 1::4]
    dh = pred_anchor_locs_numpy[:, 2::4]
    dw = pred_anchor_locs_numpy[:, 3::4]
    ctr_y = dy * anc_height[:, np.newaxis] + anc_ctr_y[:, np.newaxis]
    ctr_x = dx * anc_width[:, np.newaxis] + anc_ctr_x[:, np.newaxis]
    h = np.exp(dh) * anc_height[:, np.newaxis]
    w = np.exp(dw) * anc_width[:, np.newaxis]
    roi = np.zeros(pred_anchor_locs_numpy.shape, dtype=pred_anchor_locs_numpy.dtype)
    roi[:, 0::4] = ctr_y - 0.5 * h
    roi[:, 1::4] = ctr_x - 0.5 * w
    roi[:, 2::4] = ctr_y + 0.5 * h
    roi[:, 3::4] = ctr_x + 0.5 * w
    img_size = (imageWidth, imageWidth)
    roi[:, slice(0, 4, 2)] = np.clip(roi[:, slice(0, 4, 2)], 0, img_size[0])
    roi[:, slice(1, 4, 2)] = np.clip(roi[:, slice(1, 4, 2)], 0, img_size[1])
    hs = roi[:, 2] - roi[:, 0]
    ws = roi[:, 3] - roi[:, 1]
    keep = np.where((hs >= min_size) & (ws >= min_size))[0]
    roi = roi[keep, :]
    score = objectness_score_numpy[keep]
    order = score.ravel().argsort()[::-1]
    order = order[:min(n_train_pre_nms, len(roi), len(order))]
    roi = roi[order, :]
    y1 = roi[:, 0]
    x1 = roi[:, 1]
    y2 = roi[:, 2]
    x2 = roi[:, 3]
    areas = (x2 - x1 + 1) * (y2 - y1 + 1)
    keep = []
    while order.size > 0:
        i = order[0]
        keep += [i]
        xx1 = np.maximum(x1[i], x1[order[1:]])
        yy1 = np.maximum(y1[i], y1[order[1:]])
        xx2 = np.minimum(x2[i], x2[order[1:]])
        yy2 = np.minimum(y2[i], y2[order[1:]])
        w_ = np.maximum(0.0, xx2 - xx1 + 1)
        h_ = np.maximum(0.0, yy2 - yy1 + 1)
        inter = w_ * h_
        ovr = inter / (areas[i] + areas[order[1:]] - inter)
        inds = np.where(ovr <= nms_thresh)[0]
        order = order[inds + 1]
    keep = keep[:min(n_train_post_nms, len(roi), len(keep))]
    roi = roi[keep]
    return roi


# ----------------------------------------------------------------------------
# Pallas kernel: fully folded conv1∘(reg|cls) as 3 row-shifted MXU matmuls
# ----------------------------------------------------------------------------
def rpn_fused_kernel(x_ref, w_ref, b_ref, o_ref):
    # x_ref: (Hpad+2, Wpad, 3*Cinp) bf16 — width(kx)-im2col'ed padded input,
    #        resident (constant index map across the row grid).
    # w_ref: (9*Cinp, 128) bf16 — folded conv1∘(reg|cls) weight, rows ordered
    #        (ky, kx, cin) to match x_ref's last-dim (kx, cin) layout.
    # b_ref: (1, 128) f32 — folded bias.
    # o_ref: (th*Wpad, 128) f32 — one lane-dense unmasked store per step.
    _, w_pad, kc3 = x_ref.shape
    rows = o_ref.shape[0]
    th = rows // w_pad                       # feature-map rows per grid step
    r0 = pl.program_id(0) * th

    def tap(ky):
        # Row-shifted slab; (th, Wpad, kc3) -> (th*Wpad, kc3) is a layout
        # no-op because Wpad % 16 == 0 (bf16 sublane tile) and kc3 % 128 == 0.
        xs = x_ref[pl.ds(r0 + ky, th), :, :].reshape(rows, kc3)
        return jnp.dot(xs, w_ref[ky * kc3:(ky + 1) * kc3, :],
                       preferred_element_type=jnp.float32)

    acc = tap(0) + tap(1) + tap(2)
    o_ref[...] = acc + b_ref[...]


def rpn_head_fused(xw, wf, bf, *, th, grid_m):
    hp2, w_pad, kc3 = xw.shape
    rows_total = (hp2 - 2) * w_pad           # Hpad * Wpad
    rows_blk = th * w_pad
    out_lanes = wf.shape[1]
    ce = pl.CostEstimate(
        flops=2 * rows_total * (3 * kc3) * out_lanes,
        transcendentals=0,
        bytes_accessed=(xw.size * 2 + wf.size * 2 + bf.size * 4
                        + rows_total * out_lanes * 4),
    )
    return pl.pallas_call(
        rpn_fused_kernel,
        out_shape=jax.ShapeDtypeStruct((rows_total, out_lanes), jnp.float32),
        grid_spec=pltpu.PrefetchScalarGridSpec(
            num_scalar_prefetch=0,
            grid=(grid_m,),
            in_specs=[
                pl.BlockSpec((hp2, w_pad, kc3), lambda i: (0, 0, 0)),  # input (resident)
                pl.BlockSpec(wf.shape, lambda i: (0, 0)),              # folded weight
                pl.BlockSpec(bf.shape, lambda i: (0, 0)),              # folded bias
            ],
            out_specs=pl.BlockSpec((rows_blk, out_lanes), lambda i: (i, 0)),
        ),
        compiler_params=pltpu.CompilerParams(
            dimension_semantics=("parallel",)),   # row tiles independent (megacore)
        cost_estimate=ce,
    )(xw, wf, bf)


# ----------------------------------------------------------------------------
# Single jitted device forward: layout prep + kx-im2col + kernel + reshapes
# ----------------------------------------------------------------------------
@jax.jit
def _rpn_device_forward(x, wf, bf):
    # x: (1, Cin, H, W) float32 (NCHW, same convention as the PyTorch module)
    _, Cin, H, W = x.shape
    Cinp = wf.shape[0] // 9                  # lane-padded input channels
    Wpad = _round_up(W, 16)                  # bf16 sublane tile -> no-op reshapes

    # Row tiling: ~1024 output rows per grid step at large sizes, and at least
    # 2 grid steps whenever H >= 2 so both v7x TensorCores get work.
    if H >= 2:
        grid_m = min(max(2, _cdiv(H * Wpad, 1024)), H)
    else:
        grid_m = 1
    th = _cdiv(H, grid_m)
    grid_m = _cdiv(H, th)
    Hpad = th * grid_m

    # NCHW -> HWC, zero-pad (3x3 same conv + row/width padding + lane padding),
    # then width-only (kx) im2col: a 3x bf16 slab instead of the previous 9x
    # HBM round trip; the ky taps are handled in-kernel.
    xhwc = jnp.transpose(x[0], (1, 2, 0))                        # (H, W, Cin)
    xpad = jnp.pad(xhwc, ((1, Hpad + 1 - H),
                          (1, Wpad + 1 - W),
                          (0, Cinp - Cin)))                      # (Hpad+2, Wpad+2, Cinp)
    xw = jnp.concatenate([xpad[:, kx:kx + Wpad, :] for kx in range(3)],
                         axis=-1).astype(jnp.bfloat16)           # (Hpad+2, Wpad, 3*Cinp)

    out = rpn_head_fused(xw, wf, bf, th=th, grid_m=grid_m)       # (Hpad*Wpad, 128)
    out = out.reshape(Hpad, Wpad, -1)[:H, :W, :]                 # strip padding

    creg = N_ANCHOR * 4
    ccls = N_ANCHOR * 2
    reg = out[..., :creg]                                        # (H, W, 36) NHWC order
    cls_ = out[..., creg:creg + ccls]                            # (H, W, 18) NHWC order

    # Matches PyTorch permute(0,2,3,1).view(...) semantics.
    pred_anchor_locs = reg.reshape(1, -1, 4)
    objectness_score = cls_.reshape(1, H, W, N_ANCHOR, 2)[..., 1].reshape(1, -1)
    pred_cls_scores = cls_.reshape(1, -1, 2)
    return pred_anchor_locs, pred_cls_scores, objectness_score


# ----------------------------------------------------------------------------
# RPN model wrapper (deterministic synthetic weights, folded at init)
# ----------------------------------------------------------------------------
class RPNPallas:
    def __init__(self, key, featureWidth=8, featureChannels=32, imageWidth=32,
                 mid_channels=32):
        self.featureWidth = featureWidth
        self.featureChannels = featureChannels
        self.imageWidth = imageWidth
        self.mid_channels = mid_channels
        self.n_anchor = N_ANCHOR

        k1, k2, k3 = jax.random.split(key, 3)
        # conv1 weight in HWIO layout (3,3,Cin,Cmid); normal(0, 0.01), zero bias
        self.w1 = 0.01 * jax.random.normal(
            k1, (3, 3, featureChannels, mid_channels), dtype=jnp.float32)
        self.b1 = jnp.zeros((1, mid_channels), dtype=jnp.float32)
        # 1x1 convs == channel matmuls: (Cmid, Cout)
        self.wr = 0.01 * jax.random.normal(
            k2, (mid_channels, self.n_anchor * 4), dtype=jnp.float32)
        self.br = jnp.zeros((1, self.n_anchor * 4), dtype=jnp.float32)
        self.wc = 0.01 * jax.random.normal(
            k3, (mid_channels, self.n_anchor * 2), dtype=jnp.float32)
        self.bc = jnp.zeros((1, self.n_anchor * 2), dtype=jnp.float32)

        # ---- fold conv1 into the reg|cls heads (no inter-layer activation in
        # the reference forward), pad to lane-friendly shapes, cast bf16 ------
        Cin, Cmid = featureChannels, mid_channels
        Cinp = _round_up(Cin, 128)
        creg = self.n_anchor * 4
        ccls = self.n_anchor * 2
        cout = creg + ccls                                       # 54

        w1col = self.w1.reshape(9 * Cin, Cmid)                   # (ky,kx,cin) rows
        wrc = jnp.concatenate([self.wr, self.wc], axis=-1)       # (Cmid, 54)
        brc = jnp.concatenate([self.br, self.bc], axis=-1)       # (1, 54)

        wf = (w1col @ wrc).reshape(3, 3, Cin, cout)              # fold in f32
        wf = jnp.pad(wf, ((0, 0), (0, 0),
                          (0, Cinp - Cin), (0, OUT_PAD - cout)))
        self.wf = wf.reshape(9 * Cinp, OUT_PAD).astype(jnp.bfloat16)
        bfold = self.b1 @ wrc + brc                              # (1, 54)
        self.bf = jnp.pad(bfold, ((0, 0), (0, OUT_PAD - cout))).astype(jnp.float32)

    def forward(self, x):
        # x: NCHW (1, Cin, H, W), float32 -- same convention as the PyTorch module
        assert x.shape[0] == 1
        pred_anchor_locs, pred_cls_scores, objectness_score = _rpn_device_forward(
            x, self.wf, self.bf)
        # Single device->host crossing feeds the numpy NMS stage.
        ROIs = proposeRegions(np.asarray(pred_anchor_locs),
                              np.asarray(objectness_score),
                              self.imageWidth, self.featureWidth)
        return (ROIs, pred_anchor_locs, pred_cls_scores, objectness_score,
                pred_cls_scores)


if __name__ == "__main__":
    key = jax.random.PRNGKey(0)
    kx, kp = jax.random.split(key)
    featureWidth = 8
    featureChannels = 32
    imageWidth = 32
    model = RPNPallas(kp, featureWidth=featureWidth,
                      featureChannels=featureChannels, imageWidth=imageWidth,
                      mid_channels=32)
    x = jax.random.normal(kx, (1, featureChannels, featureWidth, featureWidth),
                          dtype=jnp.float32)
    rois, locs, cls_scores, objness, _ = model.forward(x)
    jax.block_until_ready(locs)
    jax.block_until_ready(cls_scores)
    jax.block_until_ready(objness)
    assert locs.shape == (1, featureWidth * featureWidth * 9, 4)
    assert cls_scores.shape == (1, featureWidth * featureWidth * 9, 2)
    assert objness.shape == (1, featureWidth * featureWidth * 9)
    assert rois.shape[1] == 4
    print("KERNEL_OK")
</pallas_src>

<mosaic_0001>
module attributes {stable_mosaic.version = 11 : i64} {
  func.func @rpn_fused_kernel(%arg0: i32, %arg1: memref<10x16x384xbf16, #tpu.memory_space<vmem>>, %arg2: memref<1152x128xbf16, #tpu.memory_space<vmem>>, %arg3: memref<1x128xf32, #tpu.memory_space<vmem>>, %arg4: memref<64x128xf32, #tpu.memory_space<vmem>>) attributes {dimension_semantics = [#tpu.dimension_semantics<parallel>], iteration_bounds = array<i64: 2>, scalar_prefetch = 0 : i64, scratch_operands = 0 : i64, tpu.core_type = #tpu.core_type<tc>, window_params = [{pipeline_mode = #tpu.pipeline_mode<synchronous>, transform_indices = @transform_0, window_bounds = array<i64: 10, 16, 384>}, {pipeline_mode = #tpu.pipeline_mode<synchronous>, transform_indices = @transform_1, window_bounds = array<i64: 1152, 128>}, {pipeline_mode = #tpu.pipeline_mode<synchronous>, transform_indices = @transform_2, window_bounds = array<i64: 1, 128>}, {transform_indices = @transform_3, window_bounds = array<i64: 64, 128>}]} {
    %c4_i32 = arith.constant 4 : i32
    %0 = arith.muli %arg0, %c4_i32 : i32
    %c0_i32 = arith.constant 0 : i32
    %1 = arith.addi %0, %c0_i32 : i32
    %2 = arith.index_cast %1 : i32 to index
    %c0 = arith.constant 0 : index
    %c0_0 = arith.constant 0 : index
    %3 = vector.load %arg1[%2, %c0, %c0_0] : memref<10x16x384xbf16, #tpu.memory_space<vmem>>, vector<4x16x384xbf16>
    %4 = vector.shape_cast %3 : vector<4x16x384xbf16> to vector<64x384xbf16>
    %c0_1 = arith.constant 0 : index
    %c0_2 = arith.constant 0 : index
    %5 = vector.load %arg2[%c0_1, %c0_2] : memref<1152x128xbf16, #tpu.memory_space<vmem>>, vector<384x128xbf16>
    %cst = arith.constant dense<0.000000e+00> : vector<64x128xf32>
    %6 = tpu.matmul %4, %5, %cst {dimension_numbers = #tpu.dot_dimension_numbers<[1], [0], [0], [1], [0, 0, 1, 1], [], []>} : vector<64x384xbf16>, vector<384x128xbf16>, vector<64x128xf32> -> vector<64x128xf32>
    %c1_i32 = arith.constant 1 : i32
    %7 = arith.addi %0, %c1_i32 : i32
    %8 = arith.index_cast %7 : i32 to index
    %c0_3 = arith.constant 0 : index
    %c0_4 = arith.constant 0 : index
    %9 = vector.load %arg1[%8, %c0_3, %c0_4] : memref<10x16x384xbf16, #tpu.memory_space<vmem>>, vector<4x16x384xbf16>
    %10 = vector.shape_cast %9 : vector<4x16x384xbf16> to vector<64x384xbf16>
    %c384 = arith.constant 384 : index
    %c0_5 = arith.constant 0 : index
    %11 = vector.load %arg2[%c384, %c0_5] : memref<1152x128xbf16, #tpu.memory_space<vmem>>, vector<384x128xbf16>
    %cst_6 = arith.constant dense<0.000000e+00> : vector<64x128xf32>
    %12 = tpu.matmul %10, %11, %cst_6 {dimension_numbers = #tpu.dot_dimension_numbers<[1], [0], [0], [1], [0, 0, 1, 1], [], []>} : vector<64x384xbf16>, vector<384x128xbf16>, vector<64x128xf32> -> vector<64x128xf32>
    %13 = arith.addf %6, %12 : vector<64x128xf32>
    %c2_i32 = arith.constant 2 : i32
    %14 = arith.addi %0, %c2_i32 : i32
    %15 = arith.index_cast %14 : i32 to index
    %c0_7 = arith.constant 0 : index
    %c0_8 = arith.constant 0 : index
    %16 = vector.load %arg1[%15, %c0_7, %c0_8] : memref<10x16x384xbf16, #tpu.memory_space<vmem>>, vector<4x16x384xbf16>
    %17 = vector.shape_cast %16 : vector<4x16x384xbf16> to vector<64x384xbf16>
    %c768 = arith.constant 768 : index
    %c0_9 = arith.constant 0 : index
    %18 = vector.load %arg2[%c768, %c0_9] : memref<1152x128xbf16, #tpu.memory_space<vmem>>, vector<384x128xbf16>
    %cst_10 = arith.constant dense<0.000000e+00> : vector<64x128xf32>
    %19 = tpu.matmul %17, %18, %cst_10 {dimension_numbers = #tpu.dot_dimension_numbers<[1], [0], [0], [1], [0, 0, 1, 1], [], []>} : vector<64x384xbf16>, vector<384x128xbf16>, vector<64x128xf32> -> vector<64x128xf32>
    %20 = arith.addf %13, %19 : vector<64x128xf32>
    %c0_11 = arith.constant 0 : index
    %c0_12 = arith.constant 0 : index
    %21 = vector.load %arg3[%c0_11, %c0_12] : memref<1x128xf32, #tpu.memory_space<vmem>>, vector<1x128xf32>
    %22 = vector.broadcast %21 : vector<1x128xf32> to vector<64x128xf32>
    %23 = arith.addf %20, %22 : vector<64x128xf32>
    %c0_13 = arith.constant 0 : index
    %c0_14 = arith.constant 0 : index
    %24 = vector.load %arg4[%c0_13, %c0_14] : memref<64x128xf32, #tpu.memory_space<vmem>>, vector<64x128xf32>
    tpu.vector_store %arg4[%c0_13, %c0_14], %23 {strides = array<i32>} : memref<64x128xf32, #tpu.memory_space<vmem>>, vector<64x128xf32>,
    return
  }
  func.func @transform_0(%arg0: i32) -> (i32, i32, i32) {
    %c0_i32 = arith.constant 0 : i32
    %c0_i32_0 = arith.constant 0 : i32
    %c0_i32_1 = arith.constant 0 : i32
    %c0_i32_2 = arith.constant 0 : i32
    return %c0_i32, %c0_i32_0, %c0_i32_1 : i32, i32, i32
  }
  func.func @transform_1(%arg0: i32) -> (i32, i32) {
    %c0_i32 = arith.constant 0 : i32
    %c0_i32_0 = arith.constant 0 : i32
    %c0_i32_1 = arith.constant 0 : i32
    return %c0_i32, %c0_i32_0 : i32, i32
  }
  func.func @transform_2(%arg0: i32) -> (i32, i32) {
    %c0_i32 = arith.constant 0 : i32
    %c0_i32_0 = arith.constant 0 : i32
    %c0_i32_1 = arith.constant 0 : i32
    return %c0_i32, %c0_i32_0 : i32, i32
  }
  func.func @transform_3(%arg0: i32) -> (i32, i32) {
    %c0_i32 = arith.constant 0 : i32
    %c0_i32_0 = arith.constant 0 : i32
    return %arg0, %c0_i32 : i32, i32
  }
}

</mosaic_0001>

<bundles_post_ra>
// kernel: squeeze.3
= control target key start
LH: loop header
LB: loop body
LE: loop exit
PB: predicated region body
PF: predicated region fallthrough
CT: control target
= control target key end

     0   :  { %vm37_vm0 = vcmask 48128   ;;  %vm10_vm1 = vcmask 15360   ;;  %s660_s14 = smov 122   ;;  %s661_s15 = smov 126   ;;  %vm51_vm2 = vcmask 64512   ;;  %vm23_vm3 = vcmask 31744   ;;  %s941_s0 = inlined_call_operand.vmem [shape: f32[1,8,8,9,1], index: 0, kind: input, shape index: {}]   ;;  %s942_s1 = inlined_call_operand.hbm [shape: f32[1,576], index: 1, kind: output, shape index: {}]  }
   0x1   :  { %v507_v0 = vld [vmem:[%s941_s0 + $0x2a] sm:$0x1]   ;;  %v503_v3 = vld [vmem:[%s941_s0 + $0xe] sm:$0x1]   ;;  %v509_v6 = vld [vmem:[%s941_s0 + $0x38] sm:$0x1]  }
   0x2   :  { %v508_v1 = vld [vmem:[%s941_s0 + $0x2a] sm:$0x1]   ;;  %v504_v4 = vld [vmem:[%s941_s0 + $0xe] sm:$0x1]   ;;  %v510_v7 = vld [vmem:[%s941_s0 + $0x38] sm:$0x1]  }
   0x3   :  { %v38_v2 = vsel %vm37_vm0, %v508_v1, %v507_v0  ;;  %v11_v5 = vsel %vm10_vm1, %v504_v4, %v503_v3  ;;  %v505_v8 = vld [vmem:[%s941_s0 + $0x1c] sm:$0x1]   ;;  %v511_v10 = vld [vmem:[%s941_s0 + $0xd] sm:$0x1]   ;;  %s662_s26 = smov 117   ;;  %v52_v11 = vsel %vm51_vm2, %v510_v7, %v509_v6 }
   0x4   :  { %39 = vrot.lane.b32.xlu1 %v38_v2, %s660_s14  ;;  %12 = vrot.lane.b32.xlu0 %v11_v5, %s661_s15  ;;  %v506_v9 = vld [vmem:[%s941_s0 + $0x1c] sm:$0x1]  }
   0x5   :  { %63 = vrot.lane.b32.xlu2 %v511_v10, %s662_s26  ;;  %v24_v12 = vsel %vm23_vm3, %v506_v9, %v505_v8 }
   0x6   :  { %2 = vsyncpa [#allocation1], 0  ;;  %s663_s27 = smov 120   ;;  %s664_s28 = smov 124   ;;  %v512_v13 = vld [vmem:[%s941_s0 + $0x1b] sm:$0x1]  }
   0x7   :  { %s665_s2 = smov 115   ;;  %v514_v14 = vld [vmem:[%s941_s0 + $0x37] sm:$0x1]   ;;  %v513_v15 = vld [vmem:[%s941_s0 + $0x29] sm:$0x1]   ;;  %s666_s7 = smov 111  }
   0x8   :  { %s667_s8 = smov 113   ;;  %v515_v16 = vld [vmem:[%s941_s0 + $0xc] sm:$0x1]   ;;  %s668_s11 = smov 108   ;;  %v517_v17 = vld [vmem:[%s941_s0 + $0x28] sm:$0x1]  }
   0x9   :  { %v516_v18 = vld [vmem:[%s941_s0 + $0x1a] sm:$0x1]   ;;  %s669_s16 = smov 104   ;;  %s670_s17 = smov 106   ;;  %v518_v19 = vld [vmem:[%s941_s0 + $0x36] sm:$0x1]  }
   0xa   :  { %s671_s20 = smov 102   ;;  %v520_v20 = vld [vmem:[%s941_s0 + $0x19] sm:$0x1]   ;;  %v519_v21 = vld [vmem:[%s941_s0 + $0xb] sm:$0x1]   ;;  %s672_s25 = smov 97  }
   0xb   :  { %s673_s26 = smov 99   ;;  %v521_v22 = vld [vmem:[%s941_s0 + $0x27] sm:$0x1]   ;;  %s674_s29 = smov 95   ;;  %v523_v23 = vld [vmem:[%s941_s0 + $0xa] sm:$0x1]  }
   0xc   :  { %53 = vrot.lane.b32.xlu1 %v52_v11, %s663_s27  ;;  %25 = vrot.lane.b32.xlu0 %v24_v12, %s664_s28  ;;  %v522_v24 = vld [vmem:[%s941_s0 + $0x35] sm:$0x1]   ;;  %s675_s5 = smov 90   ;;  %s676_s6 = smov 93   ;;  %v524_v25 = vld [vmem:[%s941_s0 + $0x18] sm:$0x1]  }
   0xd   :  { %69 = vrot.lane.b32.xlu2 %v512_v13, %s665_s2  ;;  %s677_s9 = smov 88   ;;  %v526_v26 = vld [vmem:[%s941_s0 + $0x34] sm:$0x1]   ;;  %v525_v27 = vld [vmem:[%s941_s0 + $0x26] sm:$0x1]   ;;  %s678_s14 = smov 84  }
   0xe   :  { %s679_s15 = smov 86   ;;  %v527_v28 = vld [vmem:[%s941_s0 + $0x9] sm:$0x1]   ;;  %s680_s18 = smov 81   ;;  %v529_v29 = vld [vmem:[%s941_s0 + $0x25] sm:$0x1]  }
   0xf   :  { %v528_v30 = vld [vmem:[%s941_s0 + $0x17] sm:$0x1]   ;;  %s681_s23 = smov 77   ;;  %s682_s24 = smov 79   ;;  %v530_v31 = vld [vmem:[%s941_s0 + $0x33] sm:$0x1]  }
  0x10   :  { %s683_s27 = smov 75   ;;  %v532_v32 = vld [vmem:[%s941_s0 + $0x16] sm:$0x1]   ;;  %v531_v33 = vld [vmem:[%s941_s0 + $0x8] sm:$0x1]   ;;  %s684_s3 = smov 70  }
  0x11   :  { %s685_s4 = smov 72   ;;  %v533_v34 = vld [vmem:[%s941_s0 + $0x24] sm:$0x1]   ;;  %v535_v35 = vld [vmem:[%s941_s0 + $0x7] sm:$0x1]   ;;  %s687_s12 = smov 63  }
  0x12   :  { %v534_v36 = vld [vmem:[%s941_s0 + $0x32] sm:$0x1]   ;;  %s688_s13 = smov 66   ;;  %v536_v37 = vld [vmem:[%s941_s0 + $0x15] sm:$0x1]   ;;  %s690_s21 = smov 57  }
  0x13   :  { %v538_v38 = vld [vmem:[%s941_s0 + $0x31] sm:$0x1]   ;;  %v537_v39 = vld [vmem:[%s941_s0 + $0x23] sm:$0x1]   ;;  %s691_s22 = smov 59   ;;  %vm4_vm4 = vcmask 72704  }
  0x14   :  { %83 = vrot.lane.b32.xlu1 %v514_v14, %s666_s7  ;;  %76 = vrot.lane.b32.xlu0 %v513_v15, %s667_s8  ;;  %s686_s7 = smov 68   ;;  %v539_v40 = vld [vmem:[%s941_s0 + $0x3f] sm:$0x1]   ;;  %v3_v41 = vld [vmem:[%s941_s0] sm:$0x1]   ;;  %s702_s30 = smov 36  }
  0x15   :  { %90 = vrot.lane.b32.xlu2 %v515_v16, %s668_s11  ;;  %5 = vst.msk [vmem:[#allocation2] sm:$0x1] %vm4_vm4, %v3_v41   ;;  %v541_v42 = vld [vmem:[%s941_s0 + $0x14] sm:$0x1]   ;;  %v540_v43 = vld [vmem:[%s941_s0 + $0x6] sm:$0x1]  }
  0x16   :  { %v542_v44 = vld [vmem:[%s941_s0 + $0x22] sm:$0x1]   ;;  %v544_v45 = vld [vmem:[%s941_s0 + $0x3e] sm:$0x1]   ;;  %v543_v46 = vld [vmem:[%s941_s0 + $0x30] sm:$0x1]  }
  0x17   :  { %v545_v48 = vld [vmem:[%s941_s0 + $0x5] sm:$0x1]   ;;  %v547_v49 = vld [vmem:[%s941_s0 + $0x21] sm:$0x1]   ;;  %v546_v50 = vld [vmem:[%s941_s0 + $0x13] sm:$0x1]  }
  0x18   :  { %v548_v52 = vld [vmem:[%s941_s0 + $0x2f] sm:$0x1]   ;;  %v550_v53 = vld [vmem:[%s941_s0 + $0x4] sm:$0x1]   ;;  %v549_v54 = vld [vmem:[%s941_s0 + $0x3d] sm:$0x1]  }
  0x19   :  { %vm41_vm5 = vcmask 23552   ;;  %s703_s2 = smov 37   ;;  %vm14_vm6 = vcmask 56320   ;;  %v551_v56 = vld [vmem:[%s941_s0 + $0x12] sm:$0x1]   ;;  %vm17_vm7 = vcmask 1048560  }
  0x1a   :  { %vm65_vm8 = vcmask 1032104   ;;  %vm92_vm9 = vcmask 958304   ;;  %v553_v59 = vld [vmem:[%s941_s0 + $0x2e] sm:$0x1]   ;;  %v552_v60 = vld [vmem:[%s941_s0 + $0x20] sm:$0x1]  }
  0x1b   :  { %s705_s10 = smov 30   ;;  %vm55_vm10 = vcmask 7168   ;;  %s706_s11 = smov 32   ;;  %vm58_vm11 = vcmask 1048512   ;;  %v554_v62 = vld [vmem:[%s941_s0 + $0x3c] sm:$0x1]  }
  0x1c   :  { %103 = vrot.lane.b32.xlu1 %v517_v17, %s669_s16  ;;  %96 = vrot.lane.b32.xlu0 %v516_v18, %s670_s17  ;;  %s689_s16 = smov 61   ;;  %vm27_vm12 = vcmask 39936   ;;  %vm30_vm13 = vcmask 1048544   ;;  %vm44_vm14 = vcmask 1048528   ;;  %vm71_vm15 = vcmask 1015704   ;;  %s708_s19 = smov 25  }
  0x1d   :  { %110 = vrot.lane.b32.xlu2 %v518_v19, %s671_s20  ;;  %v556_v1 = vld [vmem:[%s941_s0 + $0x11] sm:$0x1]   ;;  %v555_v2 = vld [vmem:[%s941_s0 + $0x3] sm:$0x1]   ;;  %vm85_vm0 = vcmask 982904   ;;  %s709_s20 = smov 27  }
  0x1e   :  { %vm78_vm1 = vcmask 999304   ;;  %v557_v4 = vld [vmem:[%s941_s0 + $0x1f] sm:$0x1]   ;;  %vm112_vm2 = vcmask 909104   ;;  %v559_v7 = vld [vmem:[%s941_s0 + $0x3b] sm:$0x1]  }
  0x1f   :  { %v558_v8 = vld [vmem:[%s941_s0 + $0x2d] sm:$0x1]   ;;  %s711_s28 = smov 19   ;;  %vm105_vm3 = vcmask 925504   ;;  %vm98_vm4 = vcmask 941904   ;;  %s714_s8 = smov 14  }
  0x20   :  { %v560_v10 = vld [vmem:[%s941_s0 + $0x2] sm:$0x1]   ;;  %v562_v13 = vld [vmem:[%s941_s0 + $0x1e] sm:$0x1]   ;;  %v561_v14 = vld [vmem:[%s941_s0 + $0x10] sm:$0x1]  }
  0x21   :  { %v563_v16 = vld [vmem:[%s941_s0 + $0x2c] sm:$0x1]   ;;  %v565_v19 = vld [vmem:[%s941_s0 + $0x1] sm:$0x1]   ;;  %s717_s17 = smov 9   ;;  %s496_s1 = sshll.u32 %s942_s1, 4  ;;  %s497_s1 = int_to_ptr.hbm [resolvable:$true] %s496_s1 }
  0x24   :  { %123 = vrot.lane.b32.xlu1 %v520_v20, %s672_s25  ;;  %117 = vrot.lane.b32.xlu0 %v519_v21, %s673_s26  ;;  %s701_s25 = smov 39   ;;  %v564_v20 = vld [vmem:[%s941_s0 + $0x3a] sm:$0x1]   ;;  %s720_s26 = smov 3  }
  0x25   :  { %130 = vrot.lane.b32.xlu2 %v521_v22, %s674_s29  ;;  %s712_s29 = smov 21   ;;  %v566_v22 = vld [vmem:[%s941_s0 + $0xf] sm:$0x1]  }
  0x2c   :  { %144 = vrot.lane.b32.xlu1 %v523_v23, %s675_s5  ;;  %137 = vrot.lane.b32.xlu0 %v522_v24, %s676_s6  ;;  %s704_s5 = smov 34  }
  0x2d   :  { %150 = vrot.lane.b32.xlu2 %v524_v25, %s677_s9  ;;  %s715_s9 = smov 16   ;;  %v568_v25 = vld [vmem:[%s941_s0 + $0x2b] sm:$0x1]  }
  0x34   :  { %164 = vrot.lane.b32.xlu1 %v526_v26, %s678_s14  ;;  %157 = vrot.lane.b32.xlu0 %v525_v27, %s679_s15  ;;  %s707_s14 = smov 28   ;;  %v567_v26 = vld [vmem:[%s941_s0 + $0x1d] sm:$0x1]  }
  0x35   :  { %171 = vrot.lane.b32.xlu2 %v527_v28, %s680_s18  ;;  %s718_s18 = smov 10   ;;  %v569_v28 = vld [vmem:[%s941_s0 + $0x39] sm:$0x1]   ;;  %s722_s0 = smov 1  }
  0x3c   :  { %184 = vrot.lane.b32.xlu1 %v529_v29, %s681_s23  ;;  %177 = vrot.lane.b32.xlu0 %v528_v30, %s682_s24  ;;  %s710_s23 = smov 23  }
  0x3d   :  { %191 = vrot.lane.b32.xlu2 %v530_v31, %s683_s27  ;;  %s692_s27 = smov 55  }
  0x44   :  { %204 = vrot.lane.b32.xlu1 %v532_v32, %s684_s3  ;;  %198 = vrot.lane.b32.xlu0 %v531_v33, %s685_s4  ;;  %s693_s3 = smov 52   ;;  %s694_s4 = smov 54  }
  0x45   :  { %211 = vrot.lane.b32.xlu2 %v533_v34, %s686_s7  ;;  %s695_s7 = smov 50  }
  0x4c   :  { %225 = vrot.lane.b32.xlu1 %v535_v35, %s687_s12  ;;  %218 = vrot.lane.b32.xlu0 %v534_v36, %s688_s13  ;;  %s696_s12 = smov 46   ;;  %s697_s13 = smov 48  }
  0x4d   :  { %231 = vrot.lane.b32.xlu2 %v536_v37, %s689_s16  ;;  %s698_s16 = smov 45  }
  0x54   :  { %245 = vrot.lane.b32.xlu1 %v538_v38, %s690_s21  ;;  %238 = vrot.lane.b32.xlu0 %v537_v39, %s691_s22  ;;  %s699_s21 = smov 41   ;;  %s700_s22 = smov 43  }
  0x55   :  { %252 = vrot.lane.b32.xlu2 %v539_v40, %s692_s27  ;;  %s721_s27 = smov 5  }
  0x5c   :  { %265 = vrot.lane.b32.xlu1 %v541_v42, %s693_s3  ;;  %259 = vrot.lane.b32.xlu0 %v540_v43, %s694_s4  ;;  %s713_s3 = smov 18  }
  0x5d   :  { %272 = vrot.lane.b32.xlu2 %v542_v44, %s695_s7 }
  0x5f   :  { %v64_v47 = vpop.permute.xlu2 %63  }
  0x64   :  { %286 = vrot.lane.b32.xlu1 %v544_v45, %s696_s12  ;;  %279 = vrot.lane.b32.xlu0 %v543_v46, %s697_s13  ;;  %s716_s12 = smov 12  }
  0x65   :  { %293 = vrot.lane.b32.xlu2 %v545_v48, %s698_s16 }
  0x67   :  { %v70_v51 = vpop.permute.xlu2 %69  }
  0x6c   :  { %306 = vrot.lane.b32.xlu1 %v547_v49, %s699_s21  ;;  %299 = vrot.lane.b32.xlu0 %v546_v50, %s700_s22  ;;  %s719_s21 = smov 7  }
  0x6d   :  { %313 = vrot.lane.b32.xlu2 %v548_v52, %s701_s25 }
  0x6f   :  { %v91_v55 = vpop.permute.xlu2 %90  }
  0x74   :  { %327 = vrot.lane.b32.xlu1 %v550_v53, %s702_s30  ;;  %320 = vrot.lane.b32.xlu0 %v549_v54, %s703_s2  ;;  %s723_s30 = smov [#allocation0]  }
  0x75   :  { %333 = vrot.lane.b32.xlu2 %v551_v56, %s704_s5  ;;  %s494_s2 = sshll.u32 %s723_s30, 4  ;;  %s495_s2 = int_to_ptr.vmem [resolvable:$true] %s494_s2 }
  0x76   :  { %v40_v57 = vpop.permute.xlu1 %39   ;;  %v13_v58 = vpop.permute.xlu0 %12  }
  0x77   :  { %43 = vst.msk [vmem:[#allocation2 + $0x18] sm:$0x1] %vm41_vm5, %v40_v57   ;;  %v111_v61 = vpop.permute.xlu2 %110   ;;  %vm132_vm5 = vcmask 851704  }
  0x78   :  { %16 = vst.msk [vmem:[#allocation2 + $0x8] sm:$0x1] %vm14_vm6, %v13_v58   ;;  %vm125_vm6 = vcmask 868104  }
  0x79   :  { %18 = vst.msk [vmem:[#allocation2] sm:$0x1] %vm17_vm7, %v13_v58   ;;  %vm119_vm7 = vcmask 884504  }
  0x7a   :  { %66 = vst.msk [vmem:[#allocation2] sm:$0x1] %vm65_vm8, %v64_v47   ;;  %vm152_vm8 = vcmask 794304  }
  0x7b   :  { %93 = vst.msk [vmem:[#allocation2] sm:$0x1] %vm92_vm9, %v91_v55   ;;  %vm146_vm9 = vcmask 810704  }
  0x7c   :  { %347 = vrot.lane.b32.xlu1 %v553_v59, %s705_s10  ;;  %340 = vrot.lane.b32.xlu0 %v552_v60, %s706_s11 }
  0x7d   :  { %354 = vrot.lane.b32.xlu2 %v554_v62, %s707_s14 }
  0x7e   :  { %v54_v63 = vpop.permute.xlu1 %53   ;;  %v26_v0 = vpop.permute.xlu0 %25  }
  0x7f   :  { %57 = vst.msk [vmem:[#allocation2 + $0x20] sm:$0x1] %vm55_vm10, %v54_v63   ;;  %v131_v3 = vpop.permute.xlu2 %130   ;;  %vm139_vm10 = vcmask 835304  }
  0x80   :  { %60 = vst.msk [vmem:[#allocation2 + $0x18] sm:$0x1] %vm58_vm11, %v54_v63   ;;  %vm173_vm11 = vcmask 736904  }
  0x81   :  { %29 = vst.msk [vmem:[#allocation2 + $0x10] sm:$0x1] %vm27_vm12, %v26_v0   ;;  %vm166_vm12 = vcmask 761504  }
  0x82   :  { %32 = vst.msk [vmem:[#allocation2 + $0x8] sm:$0x1] %vm30_vm13, %v26_v0   ;;  %vm159_vm13 = vcmask 777904  }
  0x83   :  { %46 = vst.msk [vmem:[#allocation2 + $0x10] sm:$0x1] %vm44_vm14, %v40_v57   ;;  %vm193_vm14 = vcmask 687704  }
  0x84   :  { %73 = vst.msk [vmem:[#allocation2 + $0x8] sm:$0x1] %vm71_vm15, %v70_v51   ;;  %367 = vrot.lane.b32.xlu1 %v556_v1, %s708_s19  ;;  %361 = vrot.lane.b32.xlu0 %v555_v2, %s709_s20  ;;  %vm186_vm15 = vcmask 704104  }
  0x85   :  { %374 = vrot.lane.b32.xlu2 %v557_v4, %s710_s23 }
  0x86   :  { %v84_v5 = vpop.permute.xlu1 %83   ;;  %v77_v6 = vpop.permute.xlu0 %76  }
  0x87   :  { %87 = vst.msk [vmem:[#allocation2 + $0x18] sm:$0x1] %vm85_vm0, %v84_v5   ;;  %v151_v9 = vpop.permute.xlu2 %150   ;;  %vm179_vm0 = vcmask 720504  }
  0x88   :  { %80 = vst.msk [vmem:[#allocation2 + $0x10] sm:$0x1] %vm78_vm1, %v77_v6   ;;  %vm213_vm1 = vcmask 630304  }
  0x89   :  { %114 = vst.msk [vmem:[#allocation2 + $0x18] sm:$0x1] %vm112_vm2, %v111_v61   ;;  %vm254_vm2 = vcmask 523704  }
  0x8c   :  { %388 = vrot.lane.b32.xlu1 %v559_v7, %s711_s28  ;;  %381 = vrot.lane.b32.xlu0 %v558_v8, %s712_s29 }
  0x8d   :  { %395 = vrot.lane.b32.xlu2 %v560_v10, %s713_s3 }
  0x8e   :  { %v104_v11 = vpop.permute.xlu1 %103   ;;  %v97_v12 = vpop.permute.xlu0 %96  }
  0x8f   :  { %107 = vst.msk [vmem:[#allocation2 + $0x10] sm:$0x1] %vm105_vm3, %v104_v11   ;;  %v172_v15 = vpop.permute.xlu2 %171   ;;  %vm206_vm3 = vcmask 646704  }
  0x90   :  { %100 = vst.msk [vmem:[#allocation2 + $0x8] sm:$0x1] %vm98_vm4, %v97_v12   ;;  %vm200_vm4 = vcmask 663104  }
  0x91   :  { %134 = vst.msk [vmem:[#allocation2 + $0x10] sm:$0x1] %vm132_vm5, %v131_v3   ;;  %vm233_vm5 = vcmask 572904  }
  0x94   :  { %408 = vrot.lane.b32.xlu1 %v562_v13, %s714_s8  ;;  %401 = vrot.lane.b32.xlu0 %v561_v14, %s715_s9 }
  0x95   :  { %415 = vrot.lane.b32.xlu2 %v563_v16, %s716_s12 }
  0x96   :  { %v124_v17 = vpop.permute.xlu1 %123   ;;  %v118_v18 = vpop.permute.xlu0 %117  }
  0x97   :  { %127 = vst.msk [vmem:[#allocation2 + $0x8] sm:$0x1] %vm125_vm6, %v124_v17   ;;  %v192_v21 = vpop.permute.xlu2 %191   ;;  %vm227_vm6 = vcmask 589304  }
  0x98   :  { %120 = vst.msk [vmem:[#allocation2] sm:$0x1] %vm119_vm7, %v118_v18   ;;  %vm220_vm7 = vcmask 613904  }
  0x99   :  { %154 = vst.msk [vmem:[#allocation2 + $0x8] sm:$0x1] %vm152_vm8, %v151_v9   ;;  %vm247_vm8 = vcmask 540104  }
  0x9c   :  { %429 = vrot.lane.b32.xlu1 %v565_v19, %s717_s17  ;;  %422 = vrot.lane.b32.xlu0 %v564_v20, %s718_s18 }
  0x9d   :  { %435 = vrot.lane.b32.xlu2 %v566_v22, %s719_s21 }
  0x9e   :  { %v145_v23 = vpop.permute.xlu1 %144   ;;  %v138_v24 = vpop.permute.xlu0 %137  }
  0x9f   :  { %147 = vst.msk [vmem:[#allocation2] sm:$0x1] %vm146_vm9, %v145_v23   ;;  %v212_v27 = vpop.permute.xlu2 %211   ;;  %vm240_vm9 = vcmask 556504  }
  0xa0   :  { %141 = vst.msk [vmem:[#allocation2 + $0x18] sm:$0x1] %vm139_vm10, %v138_v24   ;;  %vm274_vm10 = vcmask 482704  }
  0xa1   :  { %174 = vst.msk [vmem:[#allocation2] sm:$0x1] %vm173_vm11, %v172_v15   ;;  %vm267_vm11 = vcmask 499104  }
  0xa4   :  { %449 = vrot.lane.b32.xlu1 %v568_v25, %s720_s26  ;;  %442 = vrot.lane.b32.xlu0 %v567_v26, %s721_s27 }
  0xa5   :  { %456 = vrot.lane.b32.xlu2 %v569_v28, %s722_s0 }
  0xa6   :  { %v165_v29 = vpop.permute.xlu1 %164   ;;  %v158_v30 = vpop.permute.xlu0 %157  }
  0xa7   :  { %168 = vst.msk [vmem:[#allocation2 + $0x18] sm:$0x1] %vm166_vm12, %v165_v29   ;;  %v232_v31 = vpop.permute.xlu2 %231   ;;  %vm261_vm12 = vcmask 515504  }
  0xa8   :  { %161 = vst.msk [vmem:[#allocation2 + $0x10] sm:$0x1] %vm159_vm13, %v158_v30   ;;  %vm295_vm13 = vcmask 441704  }
  0xa9   :  { %195 = vst.msk [vmem:[#allocation2 + $0x18] sm:$0x1] %vm193_vm14, %v192_v21   ;;  %vm288_vm14 = vcmask 449904  }
  0xae   :  { %v185_v32 = vpop.permute.xlu1 %184   ;;  %v178_v33 = vpop.permute.xlu0 %177  }
  0xaf   :  { %188 = vst.msk [vmem:[#allocation2 + $0x10] sm:$0x1] %vm186_vm15, %v185_v32   ;;  %v253_v34 = vpop.permute.xlu2 %252   ;;  %vm281_vm15 = vcmask 466304  }
  0xb0   :  { %181 = vst.msk [vmem:[#allocation2 + $0x8] sm:$0x1] %vm179_vm0, %v178_v33   ;;  %vm315_vm0 = vcmask 392504  }
  0xb1   :  { %215 = vst.msk [vmem:[#allocation2 + $0x10] sm:$0x1] %vm213_vm1, %v212_v27   ;;  %vm308_vm1 = vcmask 408904  }
  0xb2   :  { %256 = vst.msk [vmem:[#allocation2 + $0x20] sm:$0x1] %vm254_vm2, %v253_v34   ;;  %vm301_vm2 = vcmask 425304  }
  0xb6   :  { %v205_v35 = vpop.permute.xlu1 %204   ;;  %v199_v36 = vpop.permute.xlu0 %198  }
  0xb7   :  { %208 = vst.msk [vmem:[#allocation2 + $0x8] sm:$0x1] %vm206_vm3, %v205_v35   ;;  %v273_v37 = vpop.permute.xlu2 %272   ;;  %vm335_vm3 = vcmask 351504  }
  0xb8   :  { %201 = vst.msk [vmem:[#allocation2] sm:$0x1] %vm200_vm4, %v199_v36   ;;  %vm329_vm4 = vcmask 367904  }
  0xb9   :  { %235 = vst.msk [vmem:[#allocation2 + $0x8] sm:$0x1] %vm233_vm5, %v232_v31   ;;  %vm322_vm5 = vcmask 376104  }
  0xbe   :  { %v226_v38 = vpop.permute.xlu1 %225   ;;  %v219_v39 = vpop.permute.xlu0 %218  }
  0xbf   :  { %228 = vst.msk [vmem:[#allocation2] sm:$0x1] %vm227_vm6, %v226_v38   ;;  %v294_v40 = vpop.permute.xlu2 %293   ;;  %vm356_vm6 = vcmask 302304  }
  0xc0   :  { %222 = vst.msk [vmem:[#allocation2 + $0x18] sm:$0x1] %vm220_vm7, %v219_v39   ;;  %vm349_vm7 = vcmask 318704  }
  0xc6   :  { %v246_v41 = vpop.permute.xlu1 %245   ;;  %v239_v42 = vpop.permute.xlu0 %238  }
  0xc7   :  { %249 = vst.msk [vmem:[#allocation2 + $0x18] sm:$0x1] %vm247_vm8, %v246_v41   ;;  %v314_v43 = vpop.permute.xlu2 %313   ;;  %vm342_vm8 = vcmask 335104  }
  0xc8   :  { %242 = vst.msk [vmem:[#allocation2 + $0x10] sm:$0x1] %vm240_vm9, %v239_v42   ;;  %vm376_vm9 = vcmask 261304  }
  0xc9   :  { %276 = vst.msk [vmem:[#allocation2 + $0x10] sm:$0x1] %vm274_vm10, %v273_v37   ;;  %vm369_vm10 = vcmask 277704  }
  0xce   :  { %v266_v44 = vpop.permute.xlu1 %265   ;;  %v260_v45 = vpop.permute.xlu0 %259  }
  0xcf   :  { %269 = vst.msk [vmem:[#allocation2 + $0x8] sm:$0x1] %vm267_vm11, %v266_v44   ;;  %v334_v46 = vpop.permute.xlu2 %333   ;;  %vm363_vm11 = vcmask 294104  }
  0xd0   :  { %262 = vst.msk [vmem:[#allocation2] sm:$0x1] %vm261_vm12, %v260_v45   ;;  %vm397_vm12 = vcmask 220304  }
  0xd1   :  { %296 = vst.msk [vmem:[#allocation2] sm:$0x1] %vm295_vm13, %v294_v40   ;;  %vm390_vm13 = vcmask 228504  }
  0xd6   :  { %v287_v47 = vpop.permute.xlu1 %286   ;;  %v280_v48 = vpop.permute.xlu0 %279  }
  0xd7   :  { %290 = vst.msk [vmem:[#allocation2 + $0x20] sm:$0x1] %vm288_vm14, %v287_v47   ;;  %v355_v49 = vpop.permute.xlu2 %354   ;;  %vm383_vm14 = vcmask 244904  }
  0xd8   :  { %283 = vst.msk [vmem:[#allocation2 + $0x18] sm:$0x1] %vm281_vm15, %v280_v48   ;;  %vm417_vm15 = vcmask 171104  }
  0xd9   :  { %317 = vst.msk [vmem:[#allocation2 + $0x18] sm:$0x1] %vm315_vm0, %v314_v43   ;;  %vm410_vm0 = vcmask 187504  }
  0xde   :  { %v307_v50 = vpop.permute.xlu1 %306   ;;  %v300_v51 = vpop.permute.xlu0 %299  }
  0xdf   :  { %310 = vst.msk [vmem:[#allocation2 + $0x10] sm:$0x1] %vm308_vm1, %v307_v50   ;;  %v375_v52 = vpop.permute.xlu2 %374   ;;  %vm403_vm1 = vcmask 203904  }
  0xe0   :  { %303 = vst.msk [vmem:[#allocation2 + $0x8] sm:$0x1] %vm301_vm2, %v300_v51   ;;  %vm437_vm2 = vcmask 130104  }
  0xe1   :  { %337 = vst.msk [vmem:[#allocation2 + $0x8] sm:$0x1] %vm335_vm3, %v334_v46   ;;  %vm431_vm3 = vcmask 146504  }
  0xe6   :  { %v328_v53 = vpop.permute.xlu1 %327   ;;  %v321_v54 = vpop.permute.xlu0 %320  }
  0xe7   :  { %330 = vst.msk [vmem:[#allocation2] sm:$0x1] %vm329_vm4, %v328_v53   ;;  %v396_v55 = vpop.permute.xlu2 %395   ;;  %vm424_vm4 = vcmask 154704  }
  0xe8   :  { %324 = vst.msk [vmem:[#allocation2 + $0x20] sm:$0x1] %vm322_vm5, %v321_v54   ;;  %vm458_vm5 = vcmask 80904  }
  0xe9   :  { %358 = vst.msk [vmem:[#allocation2 + $0x20] sm:$0x1] %vm356_vm6, %v355_v49   ;;  %vm451_vm6 = vcmask 97304  }
  0xee   :  { %v348_v56 = vpop.permute.xlu1 %347   ;;  %v341_v57 = vpop.permute.xlu0 %340  }
  0xef   :  { %351 = vst.msk [vmem:[#allocation2 + $0x18] sm:$0x1] %vm349_vm7, %v348_v56   ;;  %v416_v58 = vpop.permute.xlu2 %415   ;;  %vm444_vm7 = vcmask 113704  }
  0xf0   :  { %344 = vst.msk [vmem:[#allocation2 + $0x10] sm:$0x1] %vm342_vm8, %v341_v57  }
  0xf1   :  { %378 = vst.msk [vmem:[#allocation2 + $0x10] sm:$0x1] %vm376_vm9, %v375_v52  }
  0xf6   :  { %v368_v59 = vpop.permute.xlu1 %367   ;;  %v362_v60 = vpop.permute.xlu0 %361  }
  0xf7   :  { %371 = vst.msk [vmem:[#allocation2 + $0x8] sm:$0x1] %vm369_vm10, %v368_v59   ;;  %v436_v61 = vpop.permute.xlu2 %435  }
  0xf8   :  { %364 = vst.msk [vmem:[#allocation2] sm:$0x1] %vm363_vm11, %v362_v60  }
  0xf9   :  { %398 = vst.msk [vmem:[#allocation2] sm:$0x1] %vm397_vm12, %v396_v55  }
  0xfe   :  { %v389_v62 = vpop.permute.xlu1 %388   ;;  %v382_v63 = vpop.permute.xlu0 %381  }
  0xff   :  { %392 = vst.msk [vmem:[#allocation2 + $0x20] sm:$0x1] %vm390_vm13, %v389_v62   ;;  %v457_v0 = vpop.permute.xlu2 %456  }
 0x100   :  { %385 = vst.msk [vmem:[#allocation2 + $0x18] sm:$0x1] %vm383_vm14, %v382_v63  }
 0x101   :  { %419 = vst.msk [vmem:[#allocation2 + $0x18] sm:$0x1] %vm417_vm15, %v416_v58  }
 0x106   :  { %v409_v1 = vpop.permute.xlu1 %408   ;;  %v402_v2 = vpop.permute.xlu0 %401  }
 0x107   :  { %412 = vst.msk [vmem:[#allocation2 + $0x10] sm:$0x1] %vm410_vm0, %v409_v1  }
 0x108   :  { %405 = vst.msk [vmem:[#allocation2 + $0x8] sm:$0x1] %vm403_vm1, %v402_v2  }
 0x109   :  { %439 = vst.msk [vmem:[#allocation2 + $0x8] sm:$0x1] %vm437_vm2, %v436_v61  }
 0x10e   :  { %v430_v3 = vpop.permute.xlu1 %429   ;;  %v423_v4 = vpop.permute.xlu0 %422  }
 0x10f   :  { %432 = vst.msk [vmem:[#allocation2] sm:$0x1] %vm431_vm3, %v430_v3  }
 0x110   :  { %v468_v5 = vld [vmem:[#allocation2 + $0x8] sm:$0x1]  ;;  %426 = vst.msk [vmem:[#allocation2 + $0x20] sm:$0x1] %vm424_vm4, %v423_v4  }
 0x111   :  { %472 = vst [vmem:[#allocation0 + $0x1] sm:$0x1] %v468_v5 }
 0x112   :  { %460 = vst.msk [vmem:[#allocation2 + $0x20] sm:$0x1] %vm458_vm5, %v457_v0  }
 0x116   :  { %v463_v6 = vld [vmem:[#allocation2] sm:$0x1]  ;;  %v450_v7 = vpop.permute.xlu1 %449   ;;  %v443_v8 = vpop.permute.xlu0 %442  }
 0x117   :  { %466 = vst [vmem:[#allocation0] sm:$0x1] %v463_v6 }
 0x118   :  { %453 = vst.msk [vmem:[#allocation2 + $0x18] sm:$0x1] %vm451_vm6, %v450_v7  }
 0x119   :  { %v486_v9 = vld [vmem:[#allocation2 + $0x20] sm:$0x1]  ;;  %446 = vst.msk [vmem:[#allocation2 + $0x10] sm:$0x1] %vm444_vm7, %v443_v8  }
 0x11a   :  { %490 = vst [vmem:[#allocation0 + $0x4] sm:$0x1] %v486_v9 }
 0x11f   :  { %v480_v10 = vld [vmem:[#allocation2 + $0x18] sm:$0x1] }
 0x120   :  { %484 = vst [vmem:[#allocation0 + $0x3] sm:$0x1] %v480_v10  ;;  %v474_v11 = vld [vmem:[#allocation2 + $0x10] sm:$0x1] }
 0x121   :  { %478 = vst [vmem:[#allocation0 + $0x2] sm:$0x1] %v474_v11 }
 0x122   :  { %499 = dma.vmem_to_hbm [thread:$0]  %s495_s2, 80, %s497_s1, [#allocation1]  }
 0x123   :  { %658 = dma.done.wait [#allocation1], 80  }
 0x124   :  { %659 = vsyncadd [#allocation1], 4294967216 }
 0x125   :  { %502 = vsyncpa [#allocation1], 1 }

// kernel: _rpn_device_forward.1
= control target key start
LH: loop header
LB: loop body
LE: loop exit
PB: predicated region body
PF: predicated region fallthrough
CT: control target
= control target key end

     0   :  { %s1964_s12 = smov 0   ;;  %s2349_s0 = inlined_call_operand.vmem [shape: bf16[10,16,384], index: 0, kind: input, shape index: {}]   ;;  %s2350_s1 = inlined_call_operand.vmem [shape: bf16[1152,128], index: 1, kind: input, shape index: {}]   ;;  %s2351_s2 = inlined_call_operand.vmem [shape: f32[1,128], index: 2, kind: input, shape index: {}]   ;;  %s2352_s3 = inlined_call_operand.vmem [shape: f32[128,128], index: 3, kind: output, shape index: {}]  }
   0x1 LB: > { %s1323_s13 = sadd.s32 4294967295, %s1942_s12   ;;  %p1326_p0 = scmp.ge.s32.totalorder %s1942_s12, 1  ;;  %s1942_s12 = sphi %s1964_s12, %s13_s12  }
   0x2   : > { %p127_p1 = scmp.lt.s32.totalorder %s1942_s12, 3 }
   0x4   : > { %p128_p2 = pnand %p1326_p0, %p127_p1 }
   0x5   : > { %s1802_s21 = smul.u32 (!%p128_p2), 96, %s1323_s13 }
   0x6   : > { %131 = sbr.rel (%p128_p2) target bundleno = 329 (0x149), region = 32 }
   0x7   : > { %s2034_s30 = scalar_lea.vmem (!%p128_p2), %s2349_s0, %s1802_s21 }
   0xb   : > { %v1858_v0 = vld [vmem:[%s2350_s1 + $0xf8] sm:$0xff]  ;;  %v1857_v3 = vld [vmem:[%s2350_s1 + $0xf0] sm:$0xff]  ;;  %v1856_v6 = vld [vmem:[%s2350_s1 + $0xe8] sm:$0xff] }
   0xc   : > { %v1874_v1 = vld [vmem:[%s2350_s1 + $0x178] sm:$0xff]  ;;  %496 = vmatpush.bf16.msra.mxu0 %v1858_v0  ;;  %1911 = vmatpush.bf16.msra.mxu1 %v1858_v0  ;;  %v1873_v4 = vld [vmem:[%s2350_s1 + $0x170] sm:$0xff]  ;;  %v1872_v7 = vld [vmem:[%s2350_s1 + $0x168] sm:$0xff] }
   0xd   : > { %v1822_v2 = vld [vmem:[%s2350_s1 + $0x38] sm:$0xff]  ;;  %554 = vmatpush.bf16.msra.mxu2 %v1874_v1  ;;  %v1821_v5 = vld [vmem:[%s2350_s1 + $0x30] sm:$0xff]  ;;  %v1820_v8 = vld [vmem:[%s2350_s1 + $0x28] sm:$0xff] }
   0xe   : > { %791 = vmatpush.bf16.msra.mxu3 %v1822_v2  ;;  %v1855_v9 = vld [vmem:[%s2350_s1 + $0xe0] sm:$0xff]  ;;  %v1854_v12 = vld [vmem:[%s2350_s1 + $0xd8] sm:$0xff]  ;;  %v1853_v15 = vld [vmem:[%s2350_s1 + $0xd0] sm:$0xff] }
   0xf   : > { %v1871_v10 = vld [vmem:[%s2350_s1 + $0x160] sm:$0xff]  ;;  %v1870_v13 = vld [vmem:[%s2350_s1 + $0x158] sm:$0xff]  ;;  %v1869_v16 = vld [vmem:[%s2350_s1 + $0x150] sm:$0xff] }
  0x10   : > { %497 = vmatpush.bf16.msra.mxu0 %v1857_v3  ;;  %1912 = vmatpush.bf16.msra.mxu1 %v1857_v3  ;;  %v1819_v11 = vld [vmem:[%s2350_s1 + $0x20] sm:$0xff]  ;;  %v1818_v14 = vld [vmem:[%s2350_s1 + $0x18] sm:$0xff]  ;;  %v1817_v17 = vld [vmem:[%s2350_s1 + $0x10] sm:$0xff] }
  0x11   : > { %555 = vmatpush.bf16.msra.mxu2 %v1873_v4  ;;  %v1852_v18 = vld [vmem:[%s2350_s1 + $0xc8] sm:$0xff]  ;;  %v1851_v21 = vld [vmem:[%s2350_s1 + $0xc0] sm:$0xff]  ;;  %v1352_v24 = vld [vmem:[%s2034_s30 + $0x18] sm:$0xf] }
  0x12   : > { %792 = vmatpush.bf16.msra.mxu3 %v1821_v5  ;;  %v1868_v19 = vld [vmem:[%s2350_s1 + $0x148] sm:$0xff]  ;;  %v1867_v22 = vld [vmem:[%s2350_s1 + $0x140] sm:$0xff]  ;;  %v1846_v27 = vld [vmem:[%s2034_s30 + $0x50] sm:$0xf0] }
  0x13   : > { %v1816_v20 = vld [vmem:[%s2350_s1 + $0x8] sm:$0xff]  ;;  %v1815_v23 = vld [vmem:[%s2350_s1] sm:$0xff]  ;;  %v1866_v32 = vld [vmem:[%s2350_s1 + $0x138] sm:$0xff] }
  0x14   : > { %498 = vmatpush.bf16.msra.mxu0 %v1856_v6  ;;  %1913 = vmatpush.bf16.msra.mxu1 %v1856_v6  ;;  %v1840_v25 = vld [vmem:[%s2034_s30 + $0x20] sm:$0xf0]  ;;  %v1376_v26 = vld [vmem:[%s2034_s30 + $0x48] sm:$0xf]  ;;  %v1360_v28 = vld [vmem:[%s2034_s30 + $0x20] sm:$0xf] }
  0x15   : > { %556 = vmatpush.bf16.msra.mxu2 %v1872_v7  ;;  %v1841_v29 = vld [vmem:[%s2034_s30 + $0x28] sm:$0xf0]  ;;  %v1496_v30 = vld [vmem:[%s2034_s30] sm:$0xf]  ;;  %v1830_v33 = vld [vmem:[%s2350_s1 + $0x78] sm:$0xff]  ;;  %v1353_v34 = vor.u32 %v1840_v25, %v1352_v24  ;;  %v1377_v35 = vor.u32 %v1846_v27, %v1376_v26 }
  0x16   : > { %793 = vmatpush.bf16.msra.mxu3 %v1820_v8  ;;  %v1804_v31 = vld [vmem:[%s2034_s30 + $0x8] sm:$0xf0]  ;;  %v1361_v36 = vor.u32 %v1841_v29, %v1360_v28  ;;  %v1894_v38 = vld [vmem:[%s2350_s1 + $0x1b8] sm:$0xff]  ;;  %v1865_v40 = vld [vmem:[%s2350_s1 + $0x130] sm:$0xff] }
  0x17   : > { %v1497_v37 = vor.u32 %v1804_v31, %v1496_v30  ;;  %v1902_v39 = vld [vmem:[%s2350_s1 + $0x1f8] sm:$0xff]  ;;  %v1829_v41 = vld [vmem:[%s2350_s1 + $0x70] sm:$0xff]  ;;  %v1864_v44 = vld [vmem:[%s2350_s1 + $0x128] sm:$0xff] }
  0x18   : > { %499 = vmatpush.bf16.msra.mxu0 %v1855_v9  ;;  %1914 = vmatpush.bf16.msra.mxu1 %v1855_v9  ;;  %v1893_v42 = vld [vmem:[%s2350_s1 + $0x1b0] sm:$0xff]  ;;  %v1828_v45 = vld [vmem:[%s2350_s1 + $0x68] sm:$0xff]  ;;  %v1863_v48 = vld [vmem:[%s2350_s1 + $0x120] sm:$0xff] }
  0x19   : > { %557 = vmatpush.bf16.msra.mxu2 %v1871_v10  ;;  %v1901_v43 = vld [vmem:[%s2350_s1 + $0x1f0] sm:$0xff]  ;;  %v1892_v46 = vld [vmem:[%s2350_s1 + $0x1a8] sm:$0xff]  ;;  %v1827_v49 = vld [vmem:[%s2350_s1 + $0x60] sm:$0xff] }
  0x1a   : > { %794 = vmatpush.bf16.msra.mxu3 %v1819_v11  ;;  %v1900_v47 = vld [vmem:[%s2350_s1 + $0x1e8] sm:$0xff]  ;;  %v1364_v50 = vld [vmem:[%s2034_s30 + $0x30] sm:$0xf]  ;;  %v1843_v51 = vld [vmem:[%s2034_s30 + $0x38] sm:$0xf0] }
  0x1b   : > { %v1388_v52 = vld [vmem:[%s2034_s30 + $0x60] sm:$0xf]  ;;  %v1849_v53 = vld [vmem:[%s2034_s30 + $0x68] sm:$0xf0]  ;;  %v1372_v54 = vld [vmem:[%s2034_s30 + $0x38] sm:$0xf]  ;;  %v1365_v62 = vor.u32 %v1843_v51, %v1364_v50 }
  0x1c   : > { %500 = vmatpush.bf16.msra.mxu0 %v1854_v12  ;;  %1915 = vmatpush.bf16.msra.mxu1 %v1854_v12  ;;  %v1844_v55 = vld [vmem:[%s2034_s30 + $0x40] sm:$0xf0]  ;;  %v1508_v56 = vld [vmem:[%s2034_s30 + $0x18] sm:$0xf]  ;;  %v1389_v63 = vor.u32 %v1849_v53, %v1388_v52  ;;  %v1861_v3 = vld [vmem:[%s2350_s1 + $0x110] sm:$0xff] }
  0x1d   : > { %558 = vmatpush.bf16.msra.mxu2 %v1870_v13  ;;  %v1807_v57 = vld [vmem:[%s2034_s30 + $0x20] sm:$0xf0]  ;;  %v1862_v60 = vld [vmem:[%s2350_s1 + $0x118] sm:$0xff]  ;;  %v1373_v0 = vor.u32 %v1844_v55, %v1372_v54  ;;  %v1825_v4 = vld [vmem:[%s2350_s1 + $0x50] sm:$0xff] }
  0x1e   : > { %795 = vmatpush.bf16.msra.mxu3 %v1818_v14  ;;  %v1891_v58 = vld [vmem:[%s2350_s1 + $0x1a0] sm:$0xff]  ;;  %v1826_v61 = vld [vmem:[%s2350_s1 + $0x58] sm:$0xff]  ;;  %v1509_v1 = vor.u32 %v1807_v57, %v1508_v56  ;;  %v1889_v5 = vld [vmem:[%s2350_s1 + $0x190] sm:$0xff] }
  0x1f   : > { %v1899_v59 = vld [vmem:[%s2350_s1 + $0x1e0] sm:$0xff]  ;;  %v1890_v2 = vld [vmem:[%s2350_s1 + $0x198] sm:$0xff]  ;;  %v1860_v7 = vld [vmem:[%s2350_s1 + $0x108] sm:$0xff] }
  0x20   : > { %501 = vmatpush.bf16.msra.mxu0 %v1853_v15  ;;  %1916 = vmatpush.bf16.msra.mxu1 %v1853_v15  ;;  %v1898_v6 = vld [vmem:[%s2350_s1 + $0x1d8] sm:$0xff]  ;;  %v1824_v8 = vld [vmem:[%s2350_s1 + $0x48] sm:$0xff]  ;;  %v1897_v9 = vld [vmem:[%s2350_s1 + $0x1d0] sm:$0xff] }
  0x21   : > { %559 = vmatpush.bf16.msra.mxu2 %v1869_v16  ;;  %v1859_v10 = vld [vmem:[%s2350_s1 + $0x100] sm:$0xff]  ;;  %v1888_v11 = vld [vmem:[%s2350_s1 + $0x188] sm:$0xff]  ;;  %v1839_v13 = vld [vmem:[%s2034_s30 + $0x1c] sm:$0xf] }
  0x22   : > { %796 = vmatpush.bf16.msra.mxu3 %v1817_v17  ;;  %v1823_v12 = vld [vmem:[%s2350_s1 + $0x40] sm:$0xff]  ;;  %v1354_v14 = vld [vmem:[%s2034_s30 + $0x24] sm:$0xf0]  ;;  %v1384_v15 = vld [vmem:[%s2034_s30 + $0x50] sm:$0xf] }
  0x23   : > { %v1847_v16 = vld [vmem:[%s2034_s30 + $0x58] sm:$0xf0]  ;;  %v1887_v24 = vld [vmem:[%s2350_s1 + $0x180] sm:$0xff]  ;;  %v1357_v25 = vor.u32 %v1839_v13, %v1354_v14  ;;  %v1837_v29 = vld [vmem:[%s2350_s1 + $0xb0] sm:$0xff] }
  0x24   : > { %502 = vmatpush.bf16.msra.mxu0 %v1852_v18  ;;  %1917 = vmatpush.bf16.msra.mxu1 %v1852_v18  ;;  %v1838_v17 = vld [vmem:[%s2350_s1 + $0xb8] sm:$0xff]  ;;  %v1385_v27 = vor.u32 %v1847_v16, %v1384_v15  ;;  %v1909_v30 = vld [vmem:[%s2350_s1 + $0x230] sm:$0xff]  ;;  %v1895_v31 = vld [vmem:[%s2350_s1 + $0x1c0] sm:$0xff] }
  0x25   : > { %560 = vmatpush.bf16.msra.mxu2 %v1868_v19  ;;  %v1910_v18 = vld [vmem:[%s2350_s1 + $0x238] sm:$0xff]  ;;  %v1803_v19 = vld [vmem:[%s2034_s30 + $0x4] sm:$0xf]  ;;  %v1832_v51 = vld [vmem:[%s2350_s1 + $0x88] sm:$0xff] }
  0x26   : > { %797 = vmatpush.bf16.msra.mxu3 %v1816_v20  ;;  %v1498_v20 = vld [vmem:[%s2034_s30 + $0xc] sm:$0xf0]  ;;  %v1906_v50 = vld [vmem:[%s2350_s1 + $0x218] sm:$0xff]  ;;  %v1831_v53 = vld [vmem:[%s2350_s1 + $0x80] sm:$0xff] }
  0x27   : > { %v1501_v26 = vor.u32 %v1803_v19, %v1498_v20  ;;  %v1905_v52 = vld [vmem:[%s2350_s1 + $0x210] sm:$0xff]  ;;  %v1904_v54 = vld [vmem:[%s2350_s1 + $0x208] sm:$0xff]  ;;  %v1378_v56 = vld [vmem:[%s2034_s30 + $0x54] sm:$0xf0] }
  0x28   : > { %503 = vmatpush.bf16.msra.mxu0 %v1851_v21  ;;  %1918 = vmatpush.bf16.msra.mxu1 %v1851_v21  ;;  %v1896_v21 = vld [vmem:[%s2350_s1 + $0x1c8] sm:$0xff]  ;;  %v1809_v57 = vld [vmem:[%s2034_s30 + $0x34] sm:$0xf]  ;;  %v1666_v19 = vld [vmem:[%s2034_s30 + $0x38] sm:$0xf] }
  0x29   : > { %561 = vmatpush.bf16.msra.mxu2 %v1867_v22  ;;  %v1520_v22 = vld [vmem:[%s2034_s30 + $0x30] sm:$0xf]  ;;  %v1845_v55 = vld [vmem:[%s2034_s30 + $0x4c] sm:$0xf]  ;;  %v1504_v16 = vld [vmem:[%s2034_s30 + $0x8] sm:$0xf] }
  0x2a   : > { %798 = vmatpush.bf16.msra.mxu3 %v1815_v23  ;;  %v1810_v23 = vld [vmem:[%s2034_s30 + $0x38] sm:$0xf0]  ;;  %v1877_v20 = vld [vmem:[%s2034_s30 + $0x40] sm:$0xf0] }
  0x2b   : > { %504 = vmatmul.bf16.vlgmr.msra.gmra.mxu0 %v1353_v34  ;;  %514 = vmatmul.bf16.vlgmr.msra.gmra.mxu1 %v1377_v35  ;;  %v1521_v28 = vor.u32 %v1810_v23, %v1520_v22  ;;  %v1835_v34 = vld [vmem:[%s2350_s1 + $0xa0] sm:$0xff]  ;;  %v1684_v23 = vld [vmem:[%s2034_s30 + $0x6c] sm:$0xf0] }
  0x2c   : > { %525 = vmatpush.bf16.msrb.mxu1 %v1866_v32  ;;  %820 = vmatpush.bf16.msrb.mxu0 %v1830_v33  ;;  %v1836_v32 = vld [vmem:[%s2350_s1 + $0xa8] sm:$0xff]  ;;  %v1907_v35 = vld [vmem:[%s2350_s1 + $0x220] sm:$0xff] }
  0x2d   : > { %562 = vmatmul.bf16.vlgmr.msra.gmra.mxu2 %v1361_v36  ;;  %799 = vmatmul.bf16.vlgmr.msra.gmra.mxu3 %v1497_v37  ;;  %v1908_v33 = vld [vmem:[%s2350_s1 + $0x228] sm:$0xff]  ;;  %v1842_v36 = vld [vmem:[%s2034_s30 + $0x34] sm:$0xf]  ;;  %v1366_v37 = vld [vmem:[%s2034_s30 + $0x3c] sm:$0xf0] }
  0x2e   : > { %1154 = vmatpush.bf16.msrb.mxu2 %v1894_v38  ;;  %1183 = vmatpush.bf16.msrb.mxu3 %v1902_v39  ;;  %v1396_v38 = vld [vmem:[%s2034_s30 + $0x68] sm:$0xf]  ;;  %v1850_v39 = vld [vmem:[%s2034_s30 + $0x70] sm:$0xf0]  ;;  %v1881_v22 = vld [vmem:[%s2034_s30 + $0x64] sm:$0xf] }
  0x30   : > { %526 = vmatpush.bf16.msrb.mxu1 %v1865_v40  ;;  %821 = vmatpush.bf16.msrb.mxu0 %v1829_v41  ;;  %v1806_v40 = vld [vmem:[%s2034_s30 + $0x1c] sm:$0xf]  ;;  %v1510_v41 = vld [vmem:[%s2034_s30 + $0x24] sm:$0xf0] }
  0x32   : > { %1155 = vmatpush.bf16.msrb.mxu2 %v1893_v42  ;;  %1184 = vmatpush.bf16.msrb.mxu3 %v1901_v43  ;;  %v1532_v42 = vld [vmem:[%s2034_s30 + $0x48] sm:$0xf]  ;;  %v1813_v43 = vld [vmem:[%s2034_s30 + $0x50] sm:$0xf0] }
  0x34   : > { %527 = vmatpush.bf16.msrb.mxu1 %v1864_v44  ;;  %822 = vmatpush.bf16.msrb.mxu0 %v1828_v45  ;;  %v1834_v44 = vld [vmem:[%s2350_s1 + $0x98] sm:$0xff]  ;;  %v1369_v45 = vor.u32 %v1842_v36, %v1366_v37 }
  0x36   : > { %1156 = vmatpush.bf16.msrb.mxu2 %v1892_v46  ;;  %1185 = vmatpush.bf16.msrb.mxu3 %v1900_v47  ;;  %v1513_v46 = vor.u32 %v1806_v40, %v1510_v41  ;;  %v1397_v47 = vor.u32 %v1850_v39, %v1396_v38  ;;  %v1528_v40 = vld [vmem:[%s2034_s30 + $0x38] sm:$0xf]  ;;  %v1811_v41 = vld [vmem:[%s2034_s30 + $0x40] sm:$0xf0] }
  0x38   : > { %528 = vmatpush.bf16.msrb.mxu1 %v1863_v48  ;;  %823 = vmatpush.bf16.msrb.mxu0 %v1827_v49  ;;  %v1533_v48 = vor.u32 %v1813_v43, %v1532_v42  ;;  %v1833_v49 = vld [vmem:[%s2350_s1 + $0x90] sm:$0xff]  ;;  %v1690_v42 = vld [vmem:[%s2034_s30 + $0x68] sm:$0xf] }
  0x39   : > { %v1883_v43 = vld [vmem:[%s2034_s30 + $0x70] sm:$0xf0] }
  0x3a   : > { %1157 = vmatpush.bf16.msrb.mxu2 %v1891_v58  ;;  %1186 = vmatpush.bf16.msrb.mxu3 %v1899_v59  ;;  %v1522_v58 = vld [vmem:[%s2034_s30 + $0x3c] sm:$0xf0]  ;;  %v1658_v59 = vld [vmem:[%s2034_s30 + $0x30] sm:$0xf] }
  0x3b   : > { %509 = vmatmul.bf16.gmra.mxu0 %v1365_v62  ;;  %519 = vmatmul.bf16.gmra.mxu1 %v1389_v63  ;;  %v1660_v62 = vld [vmem:[%s2034_s30 + $0x3c] sm:$0xf0] }
  0x3c   : > { %529 = vmatpush.bf16.msrb.mxu1 %v1862_v60  ;;  %824 = vmatpush.bf16.msrb.mxu0 %v1826_v61  ;;  %v1876_v60 = vld [vmem:[%s2034_s30 + $0x38] sm:$0xf0]  ;;  %v1875_v61 = vld [vmem:[%s2034_s30 + $0x34] sm:$0xf]  ;;  %v1903_v63 = vld [vmem:[%s2350_s1 + $0x200] sm:$0xff] }
  0x3d   : > { %567 = vmatmul.bf16.gmra.mxu2 %v1373_v0  ;;  %804 = vmatmul.bf16.gmra.mxu3 %v1509_v1  ;;  %v1381_v0 = vor.u32 %v1845_v55, %v1378_v56  ;;  %v1525_v1 = vor.u32 %v1809_v57, %v1522_v58  ;;  %v1540_v55 = vld [vmem:[%s2034_s30 + $0x50] sm:$0xf]  ;;  %v1814_v56 = vld [vmem:[%s2034_s30 + $0x58] sm:$0xf0] }
  0x3e   : > { %1158 = vmatpush.bf16.msrb.mxu2 %v1890_v2  ;;  %1187 = vmatpush.bf16.msrb.mxu3 %v1898_v6  ;;  %v1659_v2 = vor.u32 %v1876_v60, %v1658_v59  ;;  %v1812_v6 = vld [vmem:[%s2034_s30 + $0x4c] sm:$0xf]  ;;  %v1541_v59 = vor.u32 %v1814_v56, %v1540_v55 }
  0x40   : > { %530 = vmatpush.bf16.msrb.mxu1 %v1861_v3  ;;  %825 = vmatpush.bf16.msrb.mxu0 %v1825_v4  ;;  %v1663_v3 = vor.u32 %v1875_v61, %v1660_v62  ;;  %v1848_v4 = vld [vmem:[%s2034_s30 + $0x64] sm:$0xf] }
  0x42   : > { %1159 = vmatpush.bf16.msrb.mxu2 %v1889_v5  ;;  %1188 = vmatpush.bf16.msrb.mxu3 %v1897_v9  ;;  %v1390_v5 = vld [vmem:[%s2034_s30 + $0x6c] sm:$0xf0]  ;;  %v1879_v9 = vld [vmem:[%s2034_s30 + $0x50] sm:$0xf0] }
  0x44   : > { %531 = vmatpush.bf16.msrb.mxu1 %v1860_v7  ;;  %826 = vmatpush.bf16.msrb.mxu0 %v1824_v8  ;;  %v1534_v7 = vld [vmem:[%s2034_s30 + $0x54] sm:$0xf0]  ;;  %v1670_v8 = vld [vmem:[%s2034_s30 + $0x48] sm:$0xf] }
  0x45   : > { %v1537_v13 = vor.u32 %v1812_v6, %v1534_v7  ;;  %v1671_v14 = vor.u32 %v1879_v9, %v1670_v8 }
  0x46   : > { %1160 = vmatpush.bf16.msrb.mxu2 %v1888_v11  ;;  %1189 = vmatpush.bf16.msrb.mxu3 %v1896_v21  ;;  %v1672_v11 = vld [vmem:[%s2034_s30 + $0x54] sm:$0xf0]  ;;  %v1882_v21 = vld [vmem:[%s2034_s30 + $0x68] sm:$0xf0] }
  0x48   : > { %532 = vmatpush.bf16.msrb.mxu1 %v1859_v10  ;;  %827 = vmatpush.bf16.msrb.mxu0 %v1823_v12  ;;  %v1878_v10 = vld [vmem:[%s2034_s30 + $0x4c] sm:$0xf]  ;;  %v1393_v12 = vor.u32 %v1848_v4, %v1390_v5 }
  0x49   : > { %v1675_v15 = vor.u32 %v1878_v10, %v1672_v11 }
  0x4a   : > { %1161 = vmatpush.bf16.msrb.mxu2 %v1887_v24  ;;  %1190 = vmatpush.bf16.msrb.mxu3 %v1895_v31  ;;  %v1678_v31 = vld [vmem:[%s2034_s30 + $0x50] sm:$0xf] }
  0x4b   : > { %533 = vmatmul.bf16.vlgmr.msrb.gmra.mxu1 %v1357_v25  ;;  %828 = vmatmul.bf16.vlgmr.msrb.gmra.mxu0 %v1501_v26  ;;  %v1667_v25 = vor.u32 %v1877_v20, %v1666_v19 }
  0x4c   : > { %849 = vmatpush.bf16.msra.mxu1 %v1838_v17  ;;  %1212 = vmatpush.bf16.msra.mxu0 %v1910_v18  ;;  %v1805_v17 = vld [vmem:[%s2034_s30 + $0x10] sm:$0xf0] }
  0x4d   : > { %572 = vmatmul.bf16.gmra.mxu2 %v1385_v27  ;;  %809 = vmatmul.bf16.gmra.mxu3 %v1521_v28  ;;  %v1505_v24 = vor.u32 %v1805_v17, %v1504_v16  ;;  %v1687_v27 = vor.u32 %v1881_v22, %v1684_v23  ;;  %v1516_v28 = vld [vmem:[%s2034_s30 + $0x20] sm:$0xf] }
  0x4e   : > { %1919 = vmatpush.bf16.msra.mxu2 %v1910_v18  ;;  %v1682_v18 = vld [vmem:[%s2034_s30 + $0x60] sm:$0xf] }
  0x4f   : > { %v1683_v26 = vor.u32 %v1882_v21, %v1682_v18 }
  0x50   : > { %850 = vmatpush.bf16.msra.mxu1 %v1837_v29  ;;  %1213 = vmatpush.bf16.msra.mxu0 %v1909_v30  ;;  %v1808_v29 = vld [vmem:[%s2034_s30 + $0x28] sm:$0xf0] }
  0x51   : > { %v1517_v36 = vor.u32 %v1808_v29, %v1516_v28 }
  0x52   : > { %1920 = vmatpush.bf16.msra.mxu2 %v1909_v30  ;;  %v1694_v30 = vld [vmem:[%s2034_s30 + $0x78] sm:$0xf] }
  0x54   : > { %851 = vmatpush.bf16.msra.mxu1 %v1836_v32  ;;  %1214 = vmatpush.bf16.msra.mxu0 %v1908_v33  ;;  %v1880_v32 = vld [vmem:[%s2034_s30 + $0x58] sm:$0xf0] }
  0x55   : > { %v1679_v37 = vor.u32 %v1880_v32, %v1678_v31 }
  0x56   : > { %1921 = vmatpush.bf16.msra.mxu2 %v1908_v33  ;;  %v1885_v33 = vld [vmem:[%s2034_s30 + $0x80] sm:$0xf0] }
  0x57   : > { %v1695_v38 = vor.u32 %v1885_v33, %v1694_v30 }
  0x58   : > { %852 = vmatpush.bf16.msra.mxu1 %v1835_v34  ;;  %1215 = vmatpush.bf16.msra.mxu0 %v1907_v35  ;;  %v1884_v34 = vld [vmem:[%s2034_s30 + $0x7c] sm:$0xf] }
  0x5a   : > { %1922 = vmatpush.bf16.msra.mxu2 %v1907_v35  ;;  %v1696_v35 = vld [vmem:[%s2034_s30 + $0x84] sm:$0xf0] }
  0x5b   : > { %538 = vmatmul.bf16.gmra.mxu1 %v1369_v45  ;;  %833 = vmatmul.bf16.gmra.mxu0 %v1513_v46  ;;  %v1699_v39 = vor.u32 %v1884_v34, %v1696_v35  ;;  %v1886_v45 = vld [vmem:[%s2034_s30 + $0x88] sm:$0xf0]  ;;  %v1529_v46 = vor.u32 %v1811_v41, %v1528_v40 }
  0x5c   : > { %853 = vmatpush.bf16.msra.mxu1 %v1834_v44  ;;  %1216 = vmatpush.bf16.msra.mxu0 %v1906_v50  ;;  %v1702_v44 = vld [vmem:[%s2034_s30 + $0x80] sm:$0xf]  ;;  %s1327_s30 = sshll.u32 %s1323_s13, 3 }
  0x5d   : > { %577 = vmatmul.bf16.gmra.mxu2 %v1397_v47  ;;  %814 = vmatmul.bf16.gmra.mxu3 %v1533_v48  ;;  %v1691_v47 = vor.u32 %v1883_v43, %v1690_v42  ;;  %p147_p3 = scmp.lt.s32.totalorder %s1327_s30, 15 }
  0x5e   : > { %1923 = vmatpush.bf16.msra.mxu2 %v1906_v50  ;;  %v1703_v50 = vor.u32 %v1886_v45, %v1702_v44 }
  0x5f   : > { %s2354_s30 = smov (!%p147_p3, %s1327_s30), 15 }
  0x60   : > { %854 = vmatpush.bf16.msra.mxu1 %v1833_v49  ;;  %1217 = vmatpush.bf16.msra.mxu0 %v1905_v52  ;;  %s1328_s13 = sshll.u32 %s2354_s30, 3 }
  0x61   : > { %s2313_s20 = scalar_lea.vmem %s2352_s3, %s1328_s13 }
  0x62   : > { %1924 = vmatpush.bf16.msra.mxu2 %v1905_v52 }
  0x64   : > { %855 = vmatpush.bf16.msra.mxu1 %v1832_v51  ;;  %1218 = vmatpush.bf16.msra.mxu0 %v1904_v54 }
  0x66   : > { %1925 = vmatpush.bf16.msra.mxu2 %v1904_v54 }
  0x68   : > { %856 = vmatpush.bf16.msra.mxu1 %v1831_v53  ;;  %1219 = vmatpush.bf16.msra.mxu0 %v1903_v63 }
  0x6a   : > { %1926 = vmatpush.bf16.msra.mxu2 %v1903_v63 }
  0x6b   : > { %543 = vmatmul.bf16.gmra.mxu1 %v1381_v0  ;;  %838 = vmatmul.bf16.gmra.mxu0 %v1525_v1 }
  0x6d   : > { %1162 = vmatmul.bf16.vlgmr.msrb.gmra.mxu2 %v1659_v2  ;;  %1191 = vmatmul.bf16.vlgmr.msrb.gmra.mxu3 %v1663_v3 }
  0x7b   : > { %548 = vmatmul.bf16.gmra.mxu1 %v1393_v12  ;;  %843 = vmatmul.bf16.gmra.mxu0 %v1537_v13 }
  0x7d   : > { %1167 = vmatmul.bf16.gmra.mxu2 %v1671_v14  ;;  %1196 = vmatmul.bf16.gmra.mxu3 %v1675_v15 }
  0x8b   : > { %857 = vmatmul.bf16.vlgmr.msra.gmra.mxu1 %v1505_v24  ;;  %1220 = vmatmul.bf16.vlgmr.msra.gmra.mxu0 %v1667_v25 }
  0x8d   : > { %1172 = vmatmul.bf16.gmra.mxu2 %v1683_v26  ;;  %1201 = vmatmul.bf16.gmra.mxu3 %v1687_v27 }
  0x9b   : > { %862 = vmatmul.bf16.gmra.mxu1 %v1517_v36  ;;  %1225 = vmatmul.bf16.gmra.mxu0 %v1679_v37 }
  0x9d   : > { %1177 = vmatmul.bf16.gmra.mxu2 %v1695_v38  ;;  %1206 = vmatmul.bf16.gmra.mxu3 %v1699_v39 }
  0xa8   : > { %v505_v48 = vpop.f32.mrf.mxu0  ;;  %v515_v49 = vpop.f32.mrf.mxu1 }
  0xab   : > { %867 = vmatmul.bf16.gmra.mxu1 %v1529_v46  ;;  %1230 = vmatmul.bf16.gmra.mxu0 %v1691_v47 }
  0xad   : > { %1235 = vmatmul.bf16.vlgmr.msra.gmra.mxu2 %v1703_v50 }
  0xb0   : > { %v563_v51 = vpop.f32.mrf.mxu2  ;;  %v2265_v52 = vpop.f32.mrf.mxu3 }
  0xb1   : > { %v507_v53 = vpop.f32.mrf.mxu0  ;;  %v517_v54 = vpop.f32.mrf.mxu1 }
  0xb8   : > { %v565_v57 = vpop.f32.mrf.mxu2  ;;  %v2269_v58 = vpop.f32.mrf.mxu3 }
  0xb9   : > { %v510_v60 = vpop.f32.mrf.mxu0  ;;  %v520_v61 = vpop.f32.mrf.mxu1 }
  0xbb   : > { %872 = vmatmul.bf16.gmra.mxu1 %v1541_v59 }
  0xc0   : > { %v568_v62 = vpop.f32.mrf.mxu2  ;;  %v2271_v63 = vpop.f32.mrf.mxu3 }
  0xc1   : > { %v512_v0 = vpop.f32.mrf.mxu0  ;;  %v522_v1 = vpop.f32.mrf.mxu1 }
  0xc8   : > { %v570_v2 = vpop.f32.mrf.mxu2  ;;  %v2273_v3 = vpop.f32.mrf.mxu3 }
  0xc9   : > { %v534_v4 = vpop.f32.mrf.mxu1  ;;  %v829_v5 = vpop.f32.mrf.mxu0 }
  0xca   : > { %v535_v6 = vadd.f32 %v534_v4, %v505_v48 }
  0xcc   : > { %v564_v7 = vadd.f32 %v563_v51, %v535_v6 }
  0xce   : > { %v801_v48 = vadd.f32 %v2265_v52, %v564_v7 }
  0xd0   : > { %v573_v8 = vpop.f32.mrf.mxu2  ;;  %v2275_v9 = vpop.f32.mrf.mxu3  ;;  %v830_v50 = vadd.f32 %v829_v5, %v801_v48 }
  0xd1   : > { %v536_v10 = vpop.f32.mrf.mxu1  ;;  %v831_v11 = vpop.f32.mrf.mxu0 }
  0xd2   : > { %v537_v12 = vadd.f32 %v536_v10, %v507_v53 }
  0xd4   : > { %v566_v13 = vadd.f32 %v565_v57, %v537_v12 }
  0xd8   : > { %v575_v14 = vpop.f32.mrf.mxu2  ;;  %v2277_v15 = vpop.f32.mrf.mxu3 }
  0xd9   : > { %v539_v16 = vpop.f32.mrf.mxu1  ;;  %v834_v17 = vpop.f32.mrf.mxu0 }
  0xda   : > { %v540_v18 = vadd.f32 %v539_v16, %v510_v60  ;;  %v2307_v60 = vld [vmem:[%s2351_s2] ss:$0 sm:$0xff] }
  0xdc   : > { %v569_v19 = vadd.f32 %v568_v62, %v540_v18 }
  0xe0   : > { %v578_v20 = vpop.f32.mrf.mxu2  ;;  %v2281_v24 = vpop.f32.mrf.mxu3 }
  0xe1   : > { %v541_v21 = vpop.f32.mrf.mxu1  ;;  %v2279_v22 = vpop.f32.mrf.mxu0 }
  0xe2   : > { %v542_v23 = vadd.f32 %v541_v21, %v512_v0 }
  0xe4   : > { %v571_v25 = vadd.f32 %v570_v2, %v542_v23 }
  0xe6   : > { %v808_v23 = vadd.f32 %v2273_v3, %v571_v25 }
  0xe8   : > { %v580_v26 = vpop.f32.mrf.mxu2  ;;  %v2287_v31 = vpop.f32.mrf.mxu3 }
  0xe9   : > { %v544_v27 = vpop.f32.mrf.mxu1  ;;  %v2283_v28 = vpop.f32.mrf.mxu0 }
  0xea   : > { %v545_v29 = vadd.f32 %v544_v27, %v515_v49 }
  0xec   : > { %v2285_v30 = vadd.f32 %v573_v8, %v545_v29 }
  0xf0   : > { %v1163_v32 = vpop.f32.mrf.mxu2  ;;  %v1192_v37 = vpop.f32.mrf.mxu3 }
  0xf1   : > { %v546_v33 = vpop.f32.mrf.mxu1  ;;  %v2289_v34 = vpop.f32.mrf.mxu0  ;;  %v1193_v51 = vadd.f32 %v1192_v37, %v1163_v32 }
  0xf2   : > { %v547_v35 = vadd.f32 %v546_v33, %v517_v54 }
  0xf4   : > { %v2291_v36 = vadd.f32 %v575_v14, %v547_v35 }
  0xf8   : > { %v1165_v38 = vpop.f32.mrf.mxu2  ;;  %v1194_v43 = vpop.f32.mrf.mxu3 }
  0xf9   : > { %v549_v39 = vpop.f32.mrf.mxu1  ;;  %v2293_v40 = vpop.f32.mrf.mxu0 }
  0xfa   : > { %v550_v41 = vadd.f32 %v549_v39, %v520_v61  ;;  %v803_v61 = vadd.f32 %v2269_v58, %v566_v13  ;;  %v806_v58 = vadd.f32 %v2271_v63, %v569_v19  ;;  %v837_v19 = vadd.f32 %v2279_v22, %v808_v23 }
  0xfc   : > { %v2295_v42 = vadd.f32 %v578_v20, %v550_v41  ;;  %v832_v0 = vadd.f32 %v831_v11, %v803_v61  ;;  %v835_v13 = vadd.f32 %v834_v17, %v806_v58 }
 0x100   : > { %v1168_v44 = vpop.f32.mrf.mxu2  ;;  %v1197_v56 = vpop.f32.mrf.mxu3 }
 0x101   : > { %v551_v45 = vpop.f32.mrf.mxu1  ;;  %v2299_v46 = vpop.f32.mrf.mxu0  ;;  %v1198_v14 = vadd.f32 %v1197_v56, %v1168_v44 }
 0x102   : > { %v552_v47 = vadd.f32 %v551_v45, %v522_v1  ;;  %v1195_v1 = vadd.f32 %v1194_v43, %v1165_v38  ;;  %v811_v38 = vadd.f32 %v2275_v9, %v2285_v30 }
 0x104   : > { %v2302_v49 = vadd.f32 %v580_v26, %v552_v47  ;;  %v840_v25 = vadd.f32 %v2283_v28, %v811_v38 }
 0x108   : > { %v1170_v53 = vpop.f32.mrf.mxu2  ;;  %v1199_v8 = vpop.f32.mrf.mxu3 }
 0x109   : > { %v858_v54 = vpop.f32.mrf.mxu1  ;;  %v1221_v55 = vpop.f32.mrf.mxu0  ;;  %v1200_v29 = vadd.f32 %v1199_v8, %v1170_v53 }
 0x10a   : > { %v859_v57 = vadd.f32 %v858_v54, %v830_v50  ;;  %v1222_v59 = vadd.f32 %v1221_v55, %v1193_v51  ;;  %v813_v50 = vadd.f32 %v2277_v15, %v2291_v36 }
 0x10c   : > { %v1241_v52 = vadd.f32 %v1222_v59, %v859_v57  ;;  %v842_v30 = vadd.f32 %v2289_v34, %v813_v50  ;;  %v816_v59 = vadd.f32 %v2281_v24, %v2295_v42 }
 0x10e   : > { %v1253_v62 = vadd.f32 %v2307_v60, %v1241_v52  ;;  %v845_v36 = vadd.f32 %v2293_v40, %v816_v59 }
 0x110   : > { %1261 = vst [vmem:[%s2313_s20] sm:$0xff] %v1253_v62  ;;  %v1173_v2 = vpop.f32.mrf.mxu2  ;;  %v1202_v27 = vpop.f32.mrf.mxu3 }
 0x111   : > { %v860_v4 = vpop.f32.mrf.mxu1  ;;  %v1223_v5 = vpop.f32.mrf.mxu0  ;;  %v1203_v41 = vadd.f32 %v1202_v27, %v1173_v2  ;;  %v818_v2 = vadd.f32 %v2287_v31, %v2302_v49 }
 0x112   : > { %v861_v6 = vadd.f32 %v860_v4, %v832_v0  ;;  %v1224_v7 = vadd.f32 %v1223_v5, %v1195_v1 }
 0x114   : > { %v1242_v10 = vadd.f32 %v1224_v7, %v861_v6  ;;  %v847_v6 = vadd.f32 %v2299_v46, %v818_v2 }
 0x116   : > { %v1254_v12 = vadd.f32 %v2307_v60, %v1242_v10 }
 0x118   : > { %1262 = vst [vmem:[%s2313_s20 + $0x8] sm:$0xff] %v1254_v12  ;;  %v1175_v16 = vpop.f32.mrf.mxu2  ;;  %v1204_v43 = vpop.f32.mrf.mxu3 }
 0x119   : > { %v863_v18 = vpop.f32.mrf.mxu1  ;;  %v1226_v11 = vpop.f32.mrf.mxu0  ;;  %v1205_v53 = vadd.f32 %v1204_v43, %v1175_v16 }
 0x11a   : > { %v864_v20 = vadd.f32 %v863_v18, %v835_v13  ;;  %v1227_v21 = vadd.f32 %v1226_v11, %v1198_v14 }
 0x11c   : > { %v1243_v26 = vadd.f32 %v1227_v21, %v864_v20 }
 0x11e   : > { %v1255_v63 = vadd.f32 %v2307_v60, %v1243_v26 }
 0x120   : > { %1263 = vst [vmem:[%s2313_s20 + $0x10] sm:$0xff] %v1255_v63  ;;  %v1178_v32 = vpop.f32.mrf.mxu2  ;;  %v1207_v57 = vpop.f32.mrf.mxu3 }
 0x121   : > { %v865_v17 = vpop.f32.mrf.mxu1  ;;  %v1228_v33 = vpop.f32.mrf.mxu0  ;;  %v1208_v62 = vadd.f32 %v1207_v57, %v1178_v32 }
 0x122   : > { %v866_v35 = vadd.f32 %v865_v17, %v837_v19  ;;  %v1229_v37 = vadd.f32 %v1228_v33, %v1200_v29 }
 0x124   : > { %v1244_v39 = vadd.f32 %v1229_v37, %v866_v35 }
 0x126   : > { %v1256_v3 = vadd.f32 %v2307_v60, %v1244_v39 }
 0x128   : > { %1264 = vst [vmem:[%s2313_s20 + $0x18] sm:$0xff] %v1256_v3  ;;  %v1180_v48 = vpop.f32.mrf.mxu2  ;;  %v1209_v5 = vpop.f32.mrf.mxu3 }
 0x129   : > { %v868_v22 = vpop.f32.mrf.mxu1  ;;  %v1231_v44 = vpop.f32.mrf.mxu0  ;;  %v1210_v7 = vadd.f32 %v1209_v5, %v1180_v48 }
 0x12a   : > { %v869_v45 = vadd.f32 %v868_v22, %v840_v25  ;;  %v1232_v47 = vadd.f32 %v1231_v44, %v1203_v41 }
 0x12c   : > { %v1245_v51 = vadd.f32 %v1232_v47, %v869_v45 }
 0x12e   : > { %v1257_v9 = vadd.f32 %v2307_v60, %v1245_v51 }
 0x130   : > { %1265 = vst [vmem:[%s2313_s20 + $0x20] sm:$0xff] %v1257_v9  ;;  %v1236_v52 = vpop.f32.mrf.mxu2 }
 0x131   : > { %v870_v28 = vpop.f32.mrf.mxu1  ;;  %v1233_v54 = vpop.f32.mrf.mxu0  ;;  %v1237_v0 = vadd.f32 %v1236_v52, %v1208_v62 }
 0x132   : > { %v871_v55 = vadd.f32 %v870_v28, %v842_v30  ;;  %v1234_v56 = vadd.f32 %v1233_v54, %v1205_v53 }
 0x134   : > { %v1246_v61 = vadd.f32 %v1234_v56, %v871_v55 }
 0x136   : > { %v1258_v15 = vadd.f32 %v2307_v60, %v1246_v61 }
 0x138   : > { %1266 = vst [vmem:[%s2313_s20 + $0x28] sm:$0xff] %v1258_v15  ;;  %v1238_v42 = vpop.f32.mrf.mxu2 }
 0x139   : > { %v873_v34 = vpop.f32.mrf.mxu1  ;;  %v1239_v40 = vadd.f32 %v1238_v42, %v1210_v7 }
 0x13a   : > { %v874_v1 = vadd.f32 %v873_v34, %v845_v36 }
 0x13c   : > { %v1247_v4 = vadd.f32 %v1237_v0, %v874_v1 }
 0x13e   : > { %v1259_v24 = vadd.f32 %v2307_v60, %v1247_v4 }
 0x140   : > { %1267 = vst [vmem:[%s2313_s20 + $0x30] sm:$0xff] %v1259_v24 }
 0x141   : > { %v875_v58 = vpop.f32.mrf.mxu1 }
 0x142   : > { %v876_v8 = vadd.f32 %v875_v58, %v847_v6 }
 0x144   : > { %v1248_v10 = vadd.f32 %v1239_v40, %v876_v8 }
 0x146   : > { %v1260_v12 = vadd.f32 %v2307_v60, %v1248_v10 }
 0x148   : > { %1268 = vst [vmem:[%s2313_s20 + $0x38] sm:$0xff] %v1260_v12 }
 0x149 PF: > { %s13_s12 = sadd.s32 1, %s1942_s12  }
 0x14a   : > { %p10_p4 = scmp.ge.s32.totalorder %s13_s12, 4  }
 0x14c   :  { %12 = sbr.rel (!%p10_p4) target bundleno = 1 (0x1), region = 62 }

</bundles_post_ra>
